<compile_context>
chip_gen: v7x
topology: tpu7x:2x2x1
jax: 0.10.0
libtpu: 0.0.40
codegen_flags: <defaults>
</compile_context>

<pallas_src>
import jax
import jax.numpy as jnp
from jax import lax
from jax.experimental import pallas as pl
from jax.experimental.pallas import tpu as pltpu

HIDDEN_SIZE = 60
INPUT_SIZE = 1
OUTPUT_SIZE = 1
NUM_LAYERS = 1  # single-layer LSTM, as in the module

_SUBLANE = 8
_LANE = 128


def _round_up(n, m):
    return ((n + m - 1) // m) * m


def _lstm_reg_kernel(x_ref, wx_ref, b_ref, wh_ref, wreg_ref, breg_ref, y_ref):
    # x_ref    : (T, Bp, 1)  f32   raw input (input_size==1), batch zero-padded to Bp
    # wx_ref   : (1, 4*Hp)   f32   input->gate weights (gate order i,f,g,o; lane-padded)
    # b_ref    : (1, 4*Hp)   f32   b_ih + b_hh (lane-padded with zeros)
    # wh_ref   : (Hp, 4*Hp)  bf16  fused hidden->gate weights (zero-padded)
    # wreg_ref : (1, Hp)     f32   Linear head weights (zero beyond H)
    # breg_ref : (1, 1)      f32   Linear head bias
    # y_ref    : (T, B, 1)   f32   per-step regression output
    T, Bp, _ = x_ref.shape
    B = y_ref.shape[1]
    Hp = wh_ref.shape[0]

    # Tiny loop-invariant rows: a handful of vregs, load once.
    wx = wx_ref[...]        # (1, 4*Hp)
    bias = b_ref[...]       # (1, 4*Hp)
    wreg = wreg_ref[...]    # (1, Hp)
    breg = breg_ref[...]    # (1, 1)

    h = jnp.zeros((Bp, Hp), jnp.float32)
    c = jnp.zeros((Bp, Hp), jnp.float32)

    # T is small and static -> plain Python unroll: every ref index below is a
    # static constant and LLO can overlap step t's EUP tail with step t+1's MXU.
    for t in range(T):
        # Input projection (input_size==1): VPU broadcast multiply-add.
        # Recurrent term: one fused bf16 MXU matmul (Bp,Hp)@(Hp,4*Hp), f32 acc.
        # wh_ref is read inside the step (no giant hoisted live range).
        gates = (x_ref[t] * wx + bias
                 + jnp.dot(h.astype(jnp.bfloat16), wh_ref[...],
                           preferred_element_type=jnp.float32))
        # Static 128-lane-aligned gate slices (PyTorch order: i, f, g, o).
        i = jax.nn.sigmoid(gates[:, 0 * Hp:1 * Hp])
        f = jax.nn.sigmoid(gates[:, 1 * Hp:2 * Hp])
        g = jnp.tanh(gates[:, 2 * Hp:3 * Hp])
        o = jax.nn.sigmoid(gates[:, 3 * Hp:4 * Hp])
        c = f * c + i * g
        h = o * jnp.tanh(c)
        # Linear head (output_size==1): lane reduction (XLU) + bias, per step.
        y = jnp.sum(h * wreg, axis=-1, keepdims=True) + breg   # (Bp, 1)
        y_ref[t] = y[:B]


def pack_lstm_reg_params(w_ih, w_hh, b_ih, b_hh, w_reg, b_reg):
    """One-time, init-time packing of torch-layout weights for the kernel.

    torch nn.LSTM stacks the 4 gates along dim 0 in order (i, f, g, o):
      w_ih: (4H, I), w_hh: (4H, H), b_ih/b_hh: (4H,).
    torch nn.Linear: w_reg: (O, H), b_reg: (O,).
    Keep this OUT of the jitted forward (it emits many tiny XLA ops).
    """
    f32 = jnp.float32
    H = w_hh.shape[1]
    I = w_ih.shape[1]
    O = w_reg.shape[0]
    assert I == 1 and O == 1, "kernel specialized to input_size=1, output_size=1"
    Hp = _round_up(H, _LANE)
    G = 4 * Hp

    wx = jnp.zeros((I, G), f32)
    wh = jnp.zeros((Hp, G), f32)
    b = jnp.zeros((1, G), f32)
    b_sum = (b_ih + b_hh).astype(f32)
    for k in range(4):  # gate order i, f, g, o
        wx = wx.at[:, k * Hp:k * Hp + H].set(w_ih[k * H:(k + 1) * H, :].T.astype(f32))
        wh = wh.at[:H, k * Hp:k * Hp + H].set(w_hh[k * H:(k + 1) * H, :].T.astype(f32))
        b = b.at[0, k * Hp:k * Hp + H].set(b_sum[k * H:(k + 1) * H])

    wreg = jnp.zeros((1, Hp), f32).at[0, :H].set(w_reg[0].astype(f32))
    breg = b_reg.reshape(1, 1).astype(f32)
    # bf16 MXU operands; f32 accumulate and f32 elementwise stay in the kernel.
    return (wx, b, wh.astype(jnp.bfloat16), wreg, breg)


@jax.jit
def lstm_reg_forward(x, packed):
    """x: (T, B, 1) f32 -> y: (T, B, 1) f32  (matches torch lstm_reg.forward)."""
    wx, b, wh_bf16, wreg, breg = packed
    T, B, I = x.shape
    Bp = _round_up(B, _SUBLANE)

    # Single tiny pad so the recurrent matmul has an 8-aligned M (sublane) dim.
    x_p = jnp.pad(x.astype(jnp.float32), ((0, 0), (0, Bp - B), (0, 0)))

    return pl.pallas_call(
        _lstm_reg_kernel,
        out_shape=jax.ShapeDtypeStruct((T, B, 1), jnp.float32),
        in_specs=[pl.BlockSpec(memory_space=pltpu.MemorySpace.VMEM)] * 6,
        out_specs=pl.BlockSpec(memory_space=pltpu.MemorySpace.VMEM),
    )(x_p, wx, b, wh_bf16, wreg, breg)


def lstm_reg_reference(x, params):
    """Pure-JAX f32 reference matching torch nn.LSTM + nn.Linear semantics."""
    w_ih, w_hh, b_ih, b_hh, w_reg, b_reg = params
    H = w_hh.shape[1]
    B = x.shape[1]

    def step(carry, x_t):
        h, c = carry
        gates = x_t @ w_ih.T + h @ w_hh.T + b_ih + b_hh
        i, f, g, o = jnp.split(gates, 4, axis=-1)
        i = jax.nn.sigmoid(i)
        f = jax.nn.sigmoid(f)
        g = jnp.tanh(g)
        o = jax.nn.sigmoid(o)
        c = f * c + i * g
        h = o * jnp.tanh(c)
        y = h @ w_reg.T + b_reg
        return (h, c), y

    h0 = jnp.zeros((B, H), jnp.float32)
    c0 = jnp.zeros((B, H), jnp.float32)
    (_, _), ys = lax.scan(step, (h0, c0), x)
    return ys


if __name__ == "__main__":
    seq_len, batch = 8, 2
    H, I, O = HIDDEN_SIZE, INPUT_SIZE, OUTPUT_SIZE

    key = jax.random.PRNGKey(0)
    k1, k2, k3, k4, k5, k6, k7 = jax.random.split(key, 7)
    bound = 1.0 / (H ** 0.5)   # torch default uniform init bound for LSTM/Linear

    w_ih = jax.random.uniform(k1, (4 * H, I), jnp.float32, -bound, bound)
    w_hh = jax.random.uniform(k2, (4 * H, H), jnp.float32, -bound, bound)
    b_ih = jax.random.uniform(k3, (4 * H,), jnp.float32, -bound, bound)
    b_hh = jax.random.uniform(k4, (4 * H,), jnp.float32, -bound, bound)
    w_reg = jax.random.uniform(k5, (O, H), jnp.float32, -bound, bound)
    b_reg = jax.random.uniform(k6, (O,), jnp.float32, -bound, bound)
    params = (w_ih, w_hh, b_ih, b_hh, w_reg, b_reg)

    x = jax.random.normal(k7, (seq_len, batch, I), jnp.float32)

    # Weight packing happens ONCE, outside the jitted hot path.
    packed = pack_lstm_reg_params(*params)
    packed = jax.tree_util.tree_map(jax.block_until_ready, packed)

    y = lstm_reg_forward(x, packed)
    jax.block_until_ready(y)

    y_ref = lstm_reg_reference(x, params)
    assert y.shape == (seq_len, batch, O), y.shape
    max_err = float(jnp.max(jnp.abs(y - y_ref)))
    # Tolerance covers bf16 recurrent-matmul operands (f32 accumulation/carry);
    # observed error is ~1e-3 at this size.
    assert jnp.allclose(y, y_ref, atol=1e-2, rtol=1e-2), (
        f"Pallas kernel output does not match reference (max abs err {max_err:.3e})")

    print("KERNEL_OK")
</pallas_src>

<mosaic_0001>
module attributes {stable_mosaic.version = 11 : i64} {
  func.func @_lstm_reg_kernel(%arg0: memref<8x8x1xf32, #tpu.memory_space<vmem>>, %arg1: memref<1x512xf32, #tpu.memory_space<vmem>>, %arg2: memref<1x512xf32, #tpu.memory_space<vmem>>, %arg3: memref<128x512xbf16, #tpu.memory_space<vmem>>, %arg4: memref<1x128xf32, #tpu.memory_space<vmem>>, %arg5: memref<1x1xf32, #tpu.memory_space<vmem>>, %arg6: memref<8x2x1xf32, #tpu.memory_space<vmem>>) attributes {dimension_semantics = [], scalar_prefetch = 0 : i64, scratch_operands = 0 : i64, tpu.core_type = #tpu.core_type<tc>} {
    %c0 = arith.constant 0 : index
    %c0_0 = arith.constant 0 : index
    %0 = vector.load %arg1[%c0, %c0_0] : memref<1x512xf32, #tpu.memory_space<vmem>>, vector<1x512xf32>
    %c0_1 = arith.constant 0 : index
    %c0_2 = arith.constant 0 : index
    %1 = vector.load %arg2[%c0_1, %c0_2] : memref<1x512xf32, #tpu.memory_space<vmem>>, vector<1x512xf32>
    %c0_3 = arith.constant 0 : index
    %c0_4 = arith.constant 0 : index
    %2 = vector.load %arg4[%c0_3, %c0_4] : memref<1x128xf32, #tpu.memory_space<vmem>>, vector<1x128xf32>
    %c0_5 = arith.constant 0 : index
    %c0_6 = arith.constant 0 : index
    %3 = vector.load %arg5[%c0_5, %c0_6] : memref<1x1xf32, #tpu.memory_space<vmem>>, vector<1x1xf32>
    %cst = arith.constant 0.000000e+00 : f32
    %4 = vector.broadcast %cst : f32 to vector<8x128xf32>
    %cst_7 = arith.constant 0.000000e+00 : f32
    %5 = vector.broadcast %cst_7 : f32 to vector<8x128xf32>
    %c0_8 = arith.constant 0 : index
    %c0_9 = arith.constant 0 : index
    %c0_10 = arith.constant 0 : index
    %6 = vector.load %arg0[%c0_8, %c0_9, %c0_10] : memref<8x8x1xf32, #tpu.memory_space<vmem>>, vector<1x8x1xf32>
    %7 = vector.shape_cast %6 : vector<1x8x1xf32> to vector<8x1xf32>
    %8 = vector.broadcast %7 : vector<8x1xf32> to vector<8x512xf32>
    %9 = vector.broadcast %0 : vector<1x512xf32> to vector<8x512xf32>
    %10 = arith.mulf %8, %9 : vector<8x512xf32>
    %11 = vector.broadcast %1 : vector<1x512xf32> to vector<8x512xf32>
    %12 = arith.addf %10, %11 : vector<8x512xf32>
    %13 = arith.truncf %4 : vector<8x128xf32> to vector<8x128xbf16>
    %c0_11 = arith.constant 0 : index
    %c0_12 = arith.constant 0 : index
    %14 = vector.load %arg3[%c0_11, %c0_12] : memref<128x512xbf16, #tpu.memory_space<vmem>>, vector<128x512xbf16>
    %cst_13 = arith.constant dense<0.000000e+00> : vector<8x512xf32>
    %15 = tpu.matmul %13, %14, %cst_13 {dimension_numbers = #tpu.dot_dimension_numbers<[1], [0], [0], [1], [0, 0, 1, 1], [], []>} : vector<8x128xbf16>, vector<128x512xbf16>, vector<8x512xf32> -> vector<8x512xf32>
    %16 = arith.addf %12, %15 : vector<8x512xf32>
    %17 = vector.extract_strided_slice %16 {offsets = [0, 0], sizes = [8, 128], strides = [1, 1]} : vector<8x512xf32> to vector<8x128xf32>
    %18 = arith.negf %17 : vector<8x128xf32>
    %19 = math.exp %18 : vector<8x128xf32>
    %cst_14 = arith.constant 1.000000e+00 : f32
    %20 = vector.broadcast %cst_14 : f32 to vector<8x128xf32>
    %21 = arith.addf %20, %19 : vector<8x128xf32>
    %22 = arith.divf %20, %21 : vector<8x128xf32>
    %23 = vector.extract_strided_slice %16 {offsets = [0, 128], sizes = [8, 128], strides = [1, 1]} : vector<8x512xf32> to vector<8x128xf32>
    %24 = arith.negf %23 : vector<8x128xf32>
    %25 = math.exp %24 : vector<8x128xf32>
    %cst_15 = arith.constant 1.000000e+00 : f32
    %26 = vector.broadcast %cst_15 : f32 to vector<8x128xf32>
    %27 = arith.addf %26, %25 : vector<8x128xf32>
    %28 = arith.divf %26, %27 : vector<8x128xf32>
    %29 = vector.extract_strided_slice %16 {offsets = [0, 256], sizes = [8, 128], strides = [1, 1]} : vector<8x512xf32> to vector<8x128xf32>
    %30 = math.tanh %29 : vector<8x128xf32>
    %31 = vector.extract_strided_slice %16 {offsets = [0, 384], sizes = [8, 128], strides = [1, 1]} : vector<8x512xf32> to vector<8x128xf32>
    %32 = arith.negf %31 : vector<8x128xf32>
    %33 = math.exp %32 : vector<8x128xf32>
    %cst_16 = arith.constant 1.000000e+00 : f32
    %34 = vector.broadcast %cst_16 : f32 to vector<8x128xf32>
    %35 = arith.addf %34, %33 : vector<8x128xf32>
    %36 = arith.divf %34, %35 : vector<8x128xf32>
    %37 = arith.mulf %28, %5 : vector<8x128xf32>
    %38 = arith.mulf %22, %30 : vector<8x128xf32>
    %39 = arith.addf %37, %38 : vector<8x128xf32>
    %40 = math.tanh %39 : vector<8x128xf32>
    %41 = arith.mulf %36, %40 : vector<8x128xf32>
    %42 = vector.broadcast %2 : vector<1x128xf32> to vector<8x128xf32>
    %43 = arith.mulf %41, %42 : vector<8x128xf32>
    %cst_17 = arith.constant dense<0.000000e+00> : vector<8xf32>
    %44 = vector.multi_reduction <add>, %43, %cst_17 [1] : vector<8x128xf32> to vector<8xf32>
    %45 = vector.shape_cast %44 : vector<8xf32> to vector<8x1xf32>
    %46 = vector.broadcast %3 : vector<1x1xf32> to vector<8x1xf32>
    %47 = arith.addf %45, %46 : vector<8x1xf32>
    %48 = vector.extract_strided_slice %47 {offsets = [0, 0], sizes = [2, 1], strides = [1, 1]} : vector<8x1xf32> to vector<2x1xf32>
    %c0_18 = arith.constant 0 : index
    %c0_19 = arith.constant 0 : index
    %c0_20 = arith.constant 0 : index
    %49 = vector.load %arg6[%c0_18, %c0_19, %c0_20] : memref<8x2x1xf32, #tpu.memory_space<vmem>>, vector<1x2x1xf32>
    %50 = vector.shape_cast %49 : vector<1x2x1xf32> to vector<2x1xf32>
    %51 = vector.shape_cast %48 : vector<2x1xf32> to vector<1x2x1xf32>
    tpu.vector_store %arg6[%c0_18, %c0_19, %c0_20], %51 {strides = array<i32>} : memref<8x2x1xf32, #tpu.memory_space<vmem>>, vector<1x2x1xf32>,
    %c1 = arith.constant 1 : index
    %c0_21 = arith.constant 0 : index
    %c0_22 = arith.constant 0 : index
    %52 = vector.load %arg0[%c1, %c0_21, %c0_22] : memref<8x8x1xf32, #tpu.memory_space<vmem>>, vector<1x8x1xf32>
    %53 = vector.shape_cast %52 : vector<1x8x1xf32> to vector<8x1xf32>
    %54 = vector.broadcast %53 : vector<8x1xf32> to vector<8x512xf32>
    %55 = vector.broadcast %0 : vector<1x512xf32> to vector<8x512xf32>
    %56 = arith.mulf %54, %55 : vector<8x512xf32>
    %57 = vector.broadcast %1 : vector<1x512xf32> to vector<8x512xf32>
    %58 = arith.addf %56, %57 : vector<8x512xf32>
    %59 = arith.truncf %41 : vector<8x128xf32> to vector<8x128xbf16>
    %c0_23 = arith.constant 0 : index
    %c0_24 = arith.constant 0 : index
    %60 = vector.load %arg3[%c0_23, %c0_24] : memref<128x512xbf16, #tpu.memory_space<vmem>>, vector<128x512xbf16>
    %cst_25 = arith.constant dense<0.000000e+00> : vector<8x512xf32>
    %61 = tpu.matmul %59, %60, %cst_25 {dimension_numbers = #tpu.dot_dimension_numbers<[1], [0], [0], [1], [0, 0, 1, 1], [], []>} : vector<8x128xbf16>, vector<128x512xbf16>, vector<8x512xf32> -> vector<8x512xf32>
    %62 = arith.addf %58, %61 : vector<8x512xf32>
    %63 = vector.extract_strided_slice %62 {offsets = [0, 0], sizes = [8, 128], strides = [1, 1]} : vector<8x512xf32> to vector<8x128xf32>
    %64 = arith.negf %63 : vector<8x128xf32>
    %65 = math.exp %64 : vector<8x128xf32>
    %cst_26 = arith.constant 1.000000e+00 : f32
    %66 = vector.broadcast %cst_26 : f32 to vector<8x128xf32>
    %67 = arith.addf %66, %65 : vector<8x128xf32>
    %68 = arith.divf %66, %67 : vector<8x128xf32>
    %69 = vector.extract_strided_slice %62 {offsets = [0, 128], sizes = [8, 128], strides = [1, 1]} : vector<8x512xf32> to vector<8x128xf32>
    %70 = arith.negf %69 : vector<8x128xf32>
    %71 = math.exp %70 : vector<8x128xf32>
    %cst_27 = arith.constant 1.000000e+00 : f32
    %72 = vector.broadcast %cst_27 : f32 to vector<8x128xf32>
    %73 = arith.addf %72, %71 : vector<8x128xf32>
    %74 = arith.divf %72, %73 : vector<8x128xf32>
    %75 = vector.extract_strided_slice %62 {offsets = [0, 256], sizes = [8, 128], strides = [1, 1]} : vector<8x512xf32> to vector<8x128xf32>
    %76 = math.tanh %75 : vector<8x128xf32>
    %77 = vector.extract_strided_slice %62 {offsets = [0, 384], sizes = [8, 128], strides = [1, 1]} : vector<8x512xf32> to vector<8x128xf32>
    %78 = arith.negf %77 : vector<8x128xf32>
    %79 = math.exp %78 : vector<8x128xf32>
    %cst_28 = arith.constant 1.000000e+00 : f32
    %80 = vector.broadcast %cst_28 : f32 to vector<8x128xf32>
    %81 = arith.addf %80, %79 : vector<8x128xf32>
    %82 = arith.divf %80, %81 : vector<8x128xf32>
    %83 = arith.mulf %74, %39 : vector<8x128xf32>
    %84 = arith.mulf %68, %76 : vector<8x128xf32>
    %85 = arith.addf %83, %84 : vector<8x128xf32>
    %86 = math.tanh %85 : vector<8x128xf32>
    %87 = arith.mulf %82, %86 : vector<8x128xf32>
    %88 = vector.broadcast %2 : vector<1x128xf32> to vector<8x128xf32>
    %89 = arith.mulf %87, %88 : vector<8x128xf32>
    %cst_29 = arith.constant dense<0.000000e+00> : vector<8xf32>
    %90 = vector.multi_reduction <add>, %89, %cst_29 [1] : vector<8x128xf32> to vector<8xf32>
    %91 = vector.shape_cast %90 : vector<8xf32> to vector<8x1xf32>
    %92 = vector.broadcast %3 : vector<1x1xf32> to vector<8x1xf32>
    %93 = arith.addf %91, %92 : vector<8x1xf32>
    %94 = vector.extract_strided_slice %93 {offsets = [0, 0], sizes = [2, 1], strides = [1, 1]} : vector<8x1xf32> to vector<2x1xf32>
    %c1_30 = arith.constant 1 : index
    %c0_31 = arith.constant 0 : index
    %c0_32 = arith.constant 0 : index
    %95 = vector.load %arg6[%c1_30, %c0_31, %c0_32] : memref<8x2x1xf32, #tpu.memory_space<vmem>>, vector<1x2x1xf32>
    %96 = vector.shape_cast %95 : vector<1x2x1xf32> to vector<2x1xf32>
    %97 = vector.shape_cast %94 : vector<2x1xf32> to vector<1x2x1xf32>
    tpu.vector_store %arg6[%c1_30, %c0_31, %c0_32], %97 {strides = array<i32>} : memref<8x2x1xf32, #tpu.memory_space<vmem>>, vector<1x2x1xf32>,
    %c2 = arith.constant 2 : index
    %c0_33 = arith.constant 0 : index
    %c0_34 = arith.constant 0 : index
    %98 = vector.load %arg0[%c2, %c0_33, %c0_34] : memref<8x8x1xf32, #tpu.memory_space<vmem>>, vector<1x8x1xf32>
    %99 = vector.shape_cast %98 : vector<1x8x1xf32> to vector<8x1xf32>
    %100 = vector.broadcast %99 : vector<8x1xf32> to vector<8x512xf32>
    %101 = vector.broadcast %0 : vector<1x512xf32> to vector<8x512xf32>
    %102 = arith.mulf %100, %101 : vector<8x512xf32>
    %103 = vector.broadcast %1 : vector<1x512xf32> to vector<8x512xf32>
    %104 = arith.addf %102, %103 : vector<8x512xf32>
    %105 = arith.truncf %87 : vector<8x128xf32> to vector<8x128xbf16>
    %c0_35 = arith.constant 0 : index
    %c0_36 = arith.constant 0 : index
    %106 = vector.load %arg3[%c0_35, %c0_36] : memref<128x512xbf16, #tpu.memory_space<vmem>>, vector<128x512xbf16>
    %cst_37 = arith.constant dense<0.000000e+00> : vector<8x512xf32>
    %107 = tpu.matmul %105, %106, %cst_37 {dimension_numbers = #tpu.dot_dimension_numbers<[1], [0], [0], [1], [0, 0, 1, 1], [], []>} : vector<8x128xbf16>, vector<128x512xbf16>, vector<8x512xf32> -> vector<8x512xf32>
    %108 = arith.addf %104, %107 : vector<8x512xf32>
    %109 = vector.extract_strided_slice %108 {offsets = [0, 0], sizes = [8, 128], strides = [1, 1]} : vector<8x512xf32> to vector<8x128xf32>
    %110 = arith.negf %109 : vector<8x128xf32>
    %111 = math.exp %110 : vector<8x128xf32>
    %cst_38 = arith.constant 1.000000e+00 : f32
    %112 = vector.broadcast %cst_38 : f32 to vector<8x128xf32>
    %113 = arith.addf %112, %111 : vector<8x128xf32>
    %114 = arith.divf %112, %113 : vector<8x128xf32>
    %115 = vector.extract_strided_slice %108 {offsets = [0, 128], sizes = [8, 128], strides = [1, 1]} : vector<8x512xf32> to vector<8x128xf32>
    %116 = arith.negf %115 : vector<8x128xf32>
    %117 = math.exp %116 : vector<8x128xf32>
    %cst_39 = arith.constant 1.000000e+00 : f32
    %118 = vector.broadcast %cst_39 : f32 to vector<8x128xf32>
    %119 = arith.addf %118, %117 : vector<8x128xf32>
    %120 = arith.divf %118, %119 : vector<8x128xf32>
    %121 = vector.extract_strided_slice %108 {offsets = [0, 256], sizes = [8, 128], strides = [1, 1]} : vector<8x512xf32> to vector<8x128xf32>
    %122 = math.tanh %121 : vector<8x128xf32>
    %123 = vector.extract_strided_slice %108 {offsets = [0, 384], sizes = [8, 128], strides = [1, 1]} : vector<8x512xf32> to vector<8x128xf32>
    %124 = arith.negf %123 : vector<8x128xf32>
    %125 = math.exp %124 : vector<8x128xf32>
    %cst_40 = arith.constant 1.000000e+00 : f32
    %126 = vector.broadcast %cst_40 : f32 to vector<8x128xf32>
    %127 = arith.addf %126, %125 : vector<8x128xf32>
    %128 = arith.divf %126, %127 : vector<8x128xf32>
    %129 = arith.mulf %120, %85 : vector<8x128xf32>
    %130 = arith.mulf %114, %122 : vector<8x128xf32>
    %131 = arith.addf %129, %130 : vector<8x128xf32>
    %132 = math.tanh %131 : vector<8x128xf32>
    %133 = arith.mulf %128, %132 : vector<8x128xf32>
    %134 = vector.broadcast %2 : vector<1x128xf32> to vector<8x128xf32>
    %135 = arith.mulf %133, %134 : vector<8x128xf32>
    %cst_41 = arith.constant dense<0.000000e+00> : vector<8xf32>
    %136 = vector.multi_reduction <add>, %135, %cst_41 [1] : vector<8x128xf32> to vector<8xf32>
    %137 = vector.shape_cast %136 : vector<8xf32> to vector<8x1xf32>
    %138 = vector.broadcast %3 : vector<1x1xf32> to vector<8x1xf32>
    %139 = arith.addf %137, %138 : vector<8x1xf32>
    %140 = vector.extract_strided_slice %139 {offsets = [0, 0], sizes = [2, 1], strides = [1, 1]} : vector<8x1xf32> to vector<2x1xf32>
    %c2_42 = arith.constant 2 : index
    %c0_43 = arith.constant 0 : index
    %c0_44 = arith.constant 0 : index
    %141 = vector.load %arg6[%c2_42, %c0_43, %c0_44] : memref<8x2x1xf32, #tpu.memory_space<vmem>>, vector<1x2x1xf32>
    %142 = vector.shape_cast %141 : vector<1x2x1xf32> to vector<2x1xf32>
    %143 = vector.shape_cast %140 : vector<2x1xf32> to vector<1x2x1xf32>
    tpu.vector_store %arg6[%c2_42, %c0_43, %c0_44], %143 {strides = array<i32>} : memref<8x2x1xf32, #tpu.memory_space<vmem>>, vector<1x2x1xf32>,
    %c3 = arith.constant 3 : index
    %c0_45 = arith.constant 0 : index
    %c0_46 = arith.constant 0 : index
    %144 = vector.load %arg0[%c3, %c0_45, %c0_46] : memref<8x8x1xf32, #tpu.memory_space<vmem>>, vector<1x8x1xf32>
    %145 = vector.shape_cast %144 : vector<1x8x1xf32> to vector<8x1xf32>
    %146 = vector.broadcast %145 : vector<8x1xf32> to vector<8x512xf32>
    %147 = vector.broadcast %0 : vector<1x512xf32> to vector<8x512xf32>
    %148 = arith.mulf %146, %147 : vector<8x512xf32>
    %149 = vector.broadcast %1 : vector<1x512xf32> to vector<8x512xf32>
    %150 = arith.addf %148, %149 : vector<8x512xf32>
    %151 = arith.truncf %133 : vector<8x128xf32> to vector<8x128xbf16>
    %c0_47 = arith.constant 0 : index
    %c0_48 = arith.constant 0 : index
    %152 = vector.load %arg3[%c0_47, %c0_48] : memref<128x512xbf16, #tpu.memory_space<vmem>>, vector<128x512xbf16>
    %cst_49 = arith.constant dense<0.000000e+00> : vector<8x512xf32>
    %153 = tpu.matmul %151, %152, %cst_49 {dimension_numbers = #tpu.dot_dimension_numbers<[1], [0], [0], [1], [0, 0, 1, 1], [], []>} : vector<8x128xbf16>, vector<128x512xbf16>, vector<8x512xf32> -> vector<8x512xf32>
    %154 = arith.addf %150, %153 : vector<8x512xf32>
    %155 = vector.extract_strided_slice %154 {offsets = [0, 0], sizes = [8, 128], strides = [1, 1]} : vector<8x512xf32> to vector<8x128xf32>
    %156 = arith.negf %155 : vector<8x128xf32>
    %157 = math.exp %156 : vector<8x128xf32>
    %cst_50 = arith.constant 1.000000e+00 : f32
    %158 = vector.broadcast %cst_50 : f32 to vector<8x128xf32>
    %159 = arith.addf %158, %157 : vector<8x128xf32>
    %160 = arith.divf %158, %159 : vector<8x128xf32>
    %161 = vector.extract_strided_slice %154 {offsets = [0, 128], sizes = [8, 128], strides = [1, 1]} : vector<8x512xf32> to vector<8x128xf32>
    %162 = arith.negf %161 : vector<8x128xf32>
    %163 = math.exp %162 : vector<8x128xf32>
    %cst_51 = arith.constant 1.000000e+00 : f32
    %164 = vector.broadcast %cst_51 : f32 to vector<8x128xf32>
    %165 = arith.addf %164, %163 : vector<8x128xf32>
    %166 = arith.divf %164, %165 : vector<8x128xf32>
    %167 = vector.extract_strided_slice %154 {offsets = [0, 256], sizes = [8, 128], strides = [1, 1]} : vector<8x512xf32> to vector<8x128xf32>
    %168 = math.tanh %167 : vector<8x128xf32>
    %169 = vector.extract_strided_slice %154 {offsets = [0, 384], sizes = [8, 128], strides = [1, 1]} : vector<8x512xf32> to vector<8x128xf32>
    %170 = arith.negf %169 : vector<8x128xf32>
    %171 = math.exp %170 : vector<8x128xf32>
    %cst_52 = arith.constant 1.000000e+00 : f32
    %172 = vector.broadcast %cst_52 : f32 to vector<8x128xf32>
    %173 = arith.addf %172, %171 : vector<8x128xf32>
    %174 = arith.divf %172, %173 : vector<8x128xf32>
    %175 = arith.mulf %166, %131 : vector<8x128xf32>
    %176 = arith.mulf %160, %168 : vector<8x128xf32>
    %177 = arith.addf %175, %176 : vector<8x128xf32>
    %178 = math.tanh %177 : vector<8x128xf32>
    %179 = arith.mulf %174, %178 : vector<8x128xf32>
    %180 = vector.broadcast %2 : vector<1x128xf32> to vector<8x128xf32>
    %181 = arith.mulf %179, %180 : vector<8x128xf32>
    %cst_53 = arith.constant dense<0.000000e+00> : vector<8xf32>
    %182 = vector.multi_reduction <add>, %181, %cst_53 [1] : vector<8x128xf32> to vector<8xf32>
    %183 = vector.shape_cast %182 : vector<8xf32> to vector<8x1xf32>
    %184 = vector.broadcast %3 : vector<1x1xf32> to vector<8x1xf32>
    %185 = arith.addf %183, %184 : vector<8x1xf32>
    %186 = vector.extract_strided_slice %185 {offsets = [0, 0], sizes = [2, 1], strides = [1, 1]} : vector<8x1xf32> to vector<2x1xf32>
    %c3_54 = arith.constant 3 : index
    %c0_55 = arith.constant 0 : index
    %c0_56 = arith.constant 0 : index
    %187 = vector.load %arg6[%c3_54, %c0_55, %c0_56] : memref<8x2x1xf32, #tpu.memory_space<vmem>>, vector<1x2x1xf32>
    %188 = vector.shape_cast %187 : vector<1x2x1xf32> to vector<2x1xf32>
    %189 = vector.shape_cast %186 : vector<2x1xf32> to vector<1x2x1xf32>
    tpu.vector_store %arg6[%c3_54, %c0_55, %c0_56], %189 {strides = array<i32>} : memref<8x2x1xf32, #tpu.memory_space<vmem>>, vector<1x2x1xf32>,
    %c4 = arith.constant 4 : index
    %c0_57 = arith.constant 0 : index
    %c0_58 = arith.constant 0 : index
    %190 = vector.load %arg0[%c4, %c0_57, %c0_58] : memref<8x8x1xf32, #tpu.memory_space<vmem>>, vector<1x8x1xf32>
    %191 = vector.shape_cast %190 : vector<1x8x1xf32> to vector<8x1xf32>
    %192 = vector.broadcast %191 : vector<8x1xf32> to vector<8x512xf32>
    %193 = vector.broadcast %0 : vector<1x512xf32> to vector<8x512xf32>
    %194 = arith.mulf %192, %193 : vector<8x512xf32>
    %195 = vector.broadcast %1 : vector<1x512xf32> to vector<8x512xf32>
    %196 = arith.addf %194, %195 : vector<8x512xf32>
    %197 = arith.truncf %179 : vector<8x128xf32> to vector<8x128xbf16>
    %c0_59 = arith.constant 0 : index
    %c0_60 = arith.constant 0 : index
    %198 = vector.load %arg3[%c0_59, %c0_60] : memref<128x512xbf16, #tpu.memory_space<vmem>>, vector<128x512xbf16>
    %cst_61 = arith.constant dense<0.000000e+00> : vector<8x512xf32>
    %199 = tpu.matmul %197, %198, %cst_61 {dimension_numbers = #tpu.dot_dimension_numbers<[1], [0], [0], [1], [0, 0, 1, 1], [], []>} : vector<8x128xbf16>, vector<128x512xbf16>, vector<8x512xf32> -> vector<8x512xf32>
    %200 = arith.addf %196, %199 : vector<8x512xf32>
    %201 = vector.extract_strided_slice %200 {offsets = [0, 0], sizes = [8, 128], strides = [1, 1]} : vector<8x512xf32> to vector<8x128xf32>
    %202 = arith.negf %201 : vector<8x128xf32>
    %203 = math.exp %202 : vector<8x128xf32>
    %cst_62 = arith.constant 1.000000e+00 : f32
    %204 = vector.broadcast %cst_62 : f32 to vector<8x128xf32>
    %205 = arith.addf %204, %203 : vector<8x128xf32>
    %206 = arith.divf %204, %205 : vector<8x128xf32>
    %207 = vector.extract_strided_slice %200 {offsets = [0, 128], sizes = [8, 128], strides = [1, 1]} : vector<8x512xf32> to vector<8x128xf32>
    %208 = arith.negf %207 : vector<8x128xf32>
    %209 = math.exp %208 : vector<8x128xf32>
    %cst_63 = arith.constant 1.000000e+00 : f32
    %210 = vector.broadcast %cst_63 : f32 to vector<8x128xf32>
    %211 = arith.addf %210, %209 : vector<8x128xf32>
    %212 = arith.divf %210, %211 : vector<8x128xf32>
    %213 = vector.extract_strided_slice %200 {offsets = [0, 256], sizes = [8, 128], strides = [1, 1]} : vector<8x512xf32> to vector<8x128xf32>
    %214 = math.tanh %213 : vector<8x128xf32>
    %215 = vector.extract_strided_slice %200 {offsets = [0, 384], sizes = [8, 128], strides = [1, 1]} : vector<8x512xf32> to vector<8x128xf32>
    %216 = arith.negf %215 : vector<8x128xf32>
    %217 = math.exp %216 : vector<8x128xf32>
    %cst_64 = arith.constant 1.000000e+00 : f32
    %218 = vector.broadcast %cst_64 : f32 to vector<8x128xf32>
    %219 = arith.addf %218, %217 : vector<8x128xf32>
    %220 = arith.divf %218, %219 : vector<8x128xf32>
    %221 = arith.mulf %212, %177 : vector<8x128xf32>
    %222 = arith.mulf %206, %214 : vector<8x128xf32>
    %223 = arith.addf %221, %222 : vector<8x128xf32>
    %224 = math.tanh %223 : vector<8x128xf32>
    %225 = arith.mulf %220, %224 : vector<8x128xf32>
    %226 = vector.broadcast %2 : vector<1x128xf32> to vector<8x128xf32>
    %227 = arith.mulf %225, %226 : vector<8x128xf32>
    %cst_65 = arith.constant dense<0.000000e+00> : vector<8xf32>
    %228 = vector.multi_reduction <add>, %227, %cst_65 [1] : vector<8x128xf32> to vector<8xf32>
    %229 = vector.shape_cast %228 : vector<8xf32> to vector<8x1xf32>
    %230 = vector.broadcast %3 : vector<1x1xf32> to vector<8x1xf32>
    %231 = arith.addf %229, %230 : vector<8x1xf32>
    %232 = vector.extract_strided_slice %231 {offsets = [0, 0], sizes = [2, 1], strides = [1, 1]} : vector<8x1xf32> to vector<2x1xf32>
    %c4_66 = arith.constant 4 : index
    %c0_67 = arith.constant 0 : index
    %c0_68 = arith.constant 0 : index
    %233 = vector.load %arg6[%c4_66, %c0_67, %c0_68] : memref<8x2x1xf32, #tpu.memory_space<vmem>>, vector<1x2x1xf32>
    %234 = vector.shape_cast %233 : vector<1x2x1xf32> to vector<2x1xf32>
    %235 = vector.shape_cast %232 : vector<2x1xf32> to vector<1x2x1xf32>
    tpu.vector_store %arg6[%c4_66, %c0_67, %c0_68], %235 {strides = array<i32>} : memref<8x2x1xf32, #tpu.memory_space<vmem>>, vector<1x2x1xf32>,
    %c5 = arith.constant 5 : index
    %c0_69 = arith.constant 0 : index
    %c0_70 = arith.constant 0 : index
    %236 = vector.load %arg0[%c5, %c0_69, %c0_70] : memref<8x8x1xf32, #tpu.memory_space<vmem>>, vector<1x8x1xf32>
    %237 = vector.shape_cast %236 : vector<1x8x1xf32> to vector<8x1xf32>
    %238 = vector.broadcast %237 : vector<8x1xf32> to vector<8x512xf32>
    %239 = vector.broadcast %0 : vector<1x512xf32> to vector<8x512xf32>
    %240 = arith.mulf %238, %239 : vector<8x512xf32>
    %241 = vector.broadcast %1 : vector<1x512xf32> to vector<8x512xf32>
    %242 = arith.addf %240, %241 : vector<8x512xf32>
    %243 = arith.truncf %225 : vector<8x128xf32> to vector<8x128xbf16>
    %c0_71 = arith.constant 0 : index
    %c0_72 = arith.constant 0 : index
    %244 = vector.load %arg3[%c0_71, %c0_72] : memref<128x512xbf16, #tpu.memory_space<vmem>>, vector<128x512xbf16>
    %cst_73 = arith.constant dense<0.000000e+00> : vector<8x512xf32>
    %245 = tpu.matmul %243, %244, %cst_73 {dimension_numbers = #tpu.dot_dimension_numbers<[1], [0], [0], [1], [0, 0, 1, 1], [], []>} : vector<8x128xbf16>, vector<128x512xbf16>, vector<8x512xf32> -> vector<8x512xf32>
    %246 = arith.addf %242, %245 : vector<8x512xf32>
    %247 = vector.extract_strided_slice %246 {offsets = [0, 0], sizes = [8, 128], strides = [1, 1]} : vector<8x512xf32> to vector<8x128xf32>
    %248 = arith.negf %247 : vector<8x128xf32>
    %249 = math.exp %248 : vector<8x128xf32>
    %cst_74 = arith.constant 1.000000e+00 : f32
    %250 = vector.broadcast %cst_74 : f32 to vector<8x128xf32>
    %251 = arith.addf %250, %249 : vector<8x128xf32>
    %252 = arith.divf %250, %251 : vector<8x128xf32>
    %253 = vector.extract_strided_slice %246 {offsets = [0, 128], sizes = [8, 128], strides = [1, 1]} : vector<8x512xf32> to vector<8x128xf32>
    %254 = arith.negf %253 : vector<8x128xf32>
    %255 = math.exp %254 : vector<8x128xf32>
    %cst_75 = arith.constant 1.000000e+00 : f32
    %256 = vector.broadcast %cst_75 : f32 to vector<8x128xf32>
    %257 = arith.addf %256, %255 : vector<8x128xf32>
    %258 = arith.divf %256, %257 : vector<8x128xf32>
    %259 = vector.extract_strided_slice %246 {offsets = [0, 256], sizes = [8, 128], strides = [1, 1]} : vector<8x512xf32> to vector<8x128xf32>
    %260 = math.tanh %259 : vector<8x128xf32>
    %261 = vector.extract_strided_slice %246 {offsets = [0, 384], sizes = [8, 128], strides = [1, 1]} : vector<8x512xf32> to vector<8x128xf32>
    %262 = arith.negf %261 : vector<8x128xf32>
    %263 = math.exp %262 : vector<8x128xf32>
    %cst_76 = arith.constant 1.000000e+00 : f32
    %264 = vector.broadcast %cst_76 : f32 to vector<8x128xf32>
    %265 = arith.addf %264, %263 : vector<8x128xf32>
    %266 = arith.divf %264, %265 : vector<8x128xf32>
    %267 = arith.mulf %258, %223 : vector<8x128xf32>
    %268 = arith.mulf %252, %260 : vector<8x128xf32>
    %269 = arith.addf %267, %268 : vector<8x128xf32>
    %270 = math.tanh %269 : vector<8x128xf32>
    %271 = arith.mulf %266, %270 : vector<8x128xf32>
    %272 = vector.broadcast %2 : vector<1x128xf32> to vector<8x128xf32>
    %273 = arith.mulf %271, %272 : vector<8x128xf32>
    %cst_77 = arith.constant dense<0.000000e+00> : vector<8xf32>
    %274 = vector.multi_reduction <add>, %273, %cst_77 [1] : vector<8x128xf32> to vector<8xf32>
    %275 = vector.shape_cast %274 : vector<8xf32> to vector<8x1xf32>
    %276 = vector.broadcast %3 : vector<1x1xf32> to vector<8x1xf32>
    %277 = arith.addf %275, %276 : vector<8x1xf32>
    %278 = vector.extract_strided_slice %277 {offsets = [0, 0], sizes = [2, 1], strides = [1, 1]} : vector<8x1xf32> to vector<2x1xf32>
    %c5_78 = arith.constant 5 : index
    %c0_79 = arith.constant 0 : index
    %c0_80 = arith.constant 0 : index
    %279 = vector.load %arg6[%c5_78, %c0_79, %c0_80] : memref<8x2x1xf32, #tpu.memory_space<vmem>>, vector<1x2x1xf32>
    %280 = vector.shape_cast %279 : vector<1x2x1xf32> to vector<2x1xf32>
    %281 = vector.shape_cast %278 : vector<2x1xf32> to vector<1x2x1xf32>
    tpu.vector_store %arg6[%c5_78, %c0_79, %c0_80], %281 {strides = array<i32>} : memref<8x2x1xf32, #tpu.memory_space<vmem>>, vector<1x2x1xf32>,
    %c6 = arith.constant 6 : index
    %c0_81 = arith.constant 0 : index
    %c0_82 = arith.constant 0 : index
    %282 = vector.load %arg0[%c6, %c0_81, %c0_82] : memref<8x8x1xf32, #tpu.memory_space<vmem>>, vector<1x8x1xf32>
    %283 = vector.shape_cast %282 : vector<1x8x1xf32> to vector<8x1xf32>
    %284 = vector.broadcast %283 : vector<8x1xf32> to vector<8x512xf32>
    %285 = vector.broadcast %0 : vector<1x512xf32> to vector<8x512xf32>
    %286 = arith.mulf %284, %285 : vector<8x512xf32>
    %287 = vector.broadcast %1 : vector<1x512xf32> to vector<8x512xf32>
    %288 = arith.addf %286, %287 : vector<8x512xf32>
    %289 = arith.truncf %271 : vector<8x128xf32> to vector<8x128xbf16>
    %c0_83 = arith.constant 0 : index
    %c0_84 = arith.constant 0 : index
    %290 = vector.load %arg3[%c0_83, %c0_84] : memref<128x512xbf16, #tpu.memory_space<vmem>>, vector<128x512xbf16>
    %cst_85 = arith.constant dense<0.000000e+00> : vector<8x512xf32>
    %291 = tpu.matmul %289, %290, %cst_85 {dimension_numbers = #tpu.dot_dimension_numbers<[1], [0], [0], [1], [0, 0, 1, 1], [], []>} : vector<8x128xbf16>, vector<128x512xbf16>, vector<8x512xf32> -> vector<8x512xf32>
    %292 = arith.addf %288, %291 : vector<8x512xf32>
    %293 = vector.extract_strided_slice %292 {offsets = [0, 0], sizes = [8, 128], strides = [1, 1]} : vector<8x512xf32> to vector<8x128xf32>
    %294 = arith.negf %293 : vector<8x128xf32>
    %295 = math.exp %294 : vector<8x128xf32>
    %cst_86 = arith.constant 1.000000e+00 : f32
    %296 = vector.broadcast %cst_86 : f32 to vector<8x128xf32>
    %297 = arith.addf %296, %295 : vector<8x128xf32>
    %298 = arith.divf %296, %297 : vector<8x128xf32>
    %299 = vector.extract_strided_slice %292 {offsets = [0, 128], sizes = [8, 128], strides = [1, 1]} : vector<8x512xf32> to vector<8x128xf32>
    %300 = arith.negf %299 : vector<8x128xf32>
    %301 = math.exp %300 : vector<8x128xf32>
    %cst_87 = arith.constant 1.000000e+00 : f32
    %302 = vector.broadcast %cst_87 : f32 to vector<8x128xf32>
    %303 = arith.addf %302, %301 : vector<8x128xf32>
    %304 = arith.divf %302, %303 : vector<8x128xf32>
    %305 = vector.extract_strided_slice %292 {offsets = [0, 256], sizes = [8, 128], strides = [1, 1]} : vector<8x512xf32> to vector<8x128xf32>
    %306 = math.tanh %305 : vector<8x128xf32>
    %307 = vector.extract_strided_slice %292 {offsets = [0, 384], sizes = [8, 128], strides = [1, 1]} : vector<8x512xf32> to vector<8x128xf32>
    %308 = arith.negf %307 : vector<8x128xf32>
    %309 = math.exp %308 : vector<8x128xf32>
    %cst_88 = arith.constant 1.000000e+00 : f32
    %310 = vector.broadcast %cst_88 : f32 to vector<8x128xf32>
    %311 = arith.addf %310, %309 : vector<8x128xf32>
    %312 = arith.divf %310, %311 : vector<8x128xf32>
    %313 = arith.mulf %304, %269 : vector<8x128xf32>
    %314 = arith.mulf %298, %306 : vector<8x128xf32>
    %315 = arith.addf %313, %314 : vector<8x128xf32>
    %316 = math.tanh %315 : vector<8x128xf32>
    %317 = arith.mulf %312, %316 : vector<8x128xf32>
    %318 = vector.broadcast %2 : vector<1x128xf32> to vector<8x128xf32>
    %319 = arith.mulf %317, %318 : vector<8x128xf32>
    %cst_89 = arith.constant dense<0.000000e+00> : vector<8xf32>
    %320 = vector.multi_reduction <add>, %319, %cst_89 [1] : vector<8x128xf32> to vector<8xf32>
    %321 = vector.shape_cast %320 : vector<8xf32> to vector<8x1xf32>
    %322 = vector.broadcast %3 : vector<1x1xf32> to vector<8x1xf32>
    %323 = arith.addf %321, %322 : vector<8x1xf32>
    %324 = vector.extract_strided_slice %323 {offsets = [0, 0], sizes = [2, 1], strides = [1, 1]} : vector<8x1xf32> to vector<2x1xf32>
    %c6_90 = arith.constant 6 : index
    %c0_91 = arith.constant 0 : index
    %c0_92 = arith.constant 0 : index
    %325 = vector.load %arg6[%c6_90, %c0_91, %c0_92] : memref<8x2x1xf32, #tpu.memory_space<vmem>>, vector<1x2x1xf32>
    %326 = vector.shape_cast %325 : vector<1x2x1xf32> to vector<2x1xf32>
    %327 = vector.shape_cast %324 : vector<2x1xf32> to vector<1x2x1xf32>
    tpu.vector_store %arg6[%c6_90, %c0_91, %c0_92], %327 {strides = array<i32>} : memref<8x2x1xf32, #tpu.memory_space<vmem>>, vector<1x2x1xf32>,
    %c7 = arith.constant 7 : index
    %c0_93 = arith.constant 0 : index
    %c0_94 = arith.constant 0 : index
    %328 = vector.load %arg0[%c7, %c0_93, %c0_94] : memref<8x8x1xf32, #tpu.memory_space<vmem>>, vector<1x8x1xf32>
    %329 = vector.shape_cast %328 : vector<1x8x1xf32> to vector<8x1xf32>
    %330 = vector.broadcast %329 : vector<8x1xf32> to vector<8x512xf32>
    %331 = vector.broadcast %0 : vector<1x512xf32> to vector<8x512xf32>
    %332 = arith.mulf %330, %331 : vector<8x512xf32>
    %333 = vector.broadcast %1 : vector<1x512xf32> to vector<8x512xf32>
    %334 = arith.addf %332, %333 : vector<8x512xf32>
    %335 = arith.truncf %317 : vector<8x128xf32> to vector<8x128xbf16>
    %c0_95 = arith.constant 0 : index
    %c0_96 = arith.constant 0 : index
    %336 = vector.load %arg3[%c0_95, %c0_96] : memref<128x512xbf16, #tpu.memory_space<vmem>>, vector<128x512xbf16>
    %cst_97 = arith.constant dense<0.000000e+00> : vector<8x512xf32>
    %337 = tpu.matmul %335, %336, %cst_97 {dimension_numbers = #tpu.dot_dimension_numbers<[1], [0], [0], [1], [0, 0, 1, 1], [], []>} : vector<8x128xbf16>, vector<128x512xbf16>, vector<8x512xf32> -> vector<8x512xf32>
    %338 = arith.addf %334, %337 : vector<8x512xf32>
    %339 = vector.extract_strided_slice %338 {offsets = [0, 0], sizes = [8, 128], strides = [1, 1]} : vector<8x512xf32> to vector<8x128xf32>
    %340 = arith.negf %339 : vector<8x128xf32>
    %341 = math.exp %340 : vector<8x128xf32>
    %cst_98 = arith.constant 1.000000e+00 : f32
    %342 = vector.broadcast %cst_98 : f32 to vector<8x128xf32>
    %343 = arith.addf %342, %341 : vector<8x128xf32>
    %344 = arith.divf %342, %343 : vector<8x128xf32>
    %345 = vector.extract_strided_slice %338 {offsets = [0, 128], sizes = [8, 128], strides = [1, 1]} : vector<8x512xf32> to vector<8x128xf32>
    %346 = arith.negf %345 : vector<8x128xf32>
    %347 = math.exp %346 : vector<8x128xf32>
    %cst_99 = arith.constant 1.000000e+00 : f32
    %348 = vector.broadcast %cst_99 : f32 to vector<8x128xf32>
    %349 = arith.addf %348, %347 : vector<8x128xf32>
    %350 = arith.divf %348, %349 : vector<8x128xf32>
    %351 = vector.extract_strided_slice %338 {offsets = [0, 256], sizes = [8, 128], strides = [1, 1]} : vector<8x512xf32> to vector<8x128xf32>
    %352 = math.tanh %351 : vector<8x128xf32>
    %353 = vector.extract_strided_slice %338 {offsets = [0, 384], sizes = [8, 128], strides = [1, 1]} : vector<8x512xf32> to vector<8x128xf32>
    %354 = arith.negf %353 : vector<8x128xf32>
    %355 = math.exp %354 : vector<8x128xf32>
    %cst_100 = arith.constant 1.000000e+00 : f32
    %356 = vector.broadcast %cst_100 : f32 to vector<8x128xf32>
    %357 = arith.addf %356, %355 : vector<8x128xf32>
    %358 = arith.divf %356, %357 : vector<8x128xf32>
    %359 = arith.mulf %350, %315 : vector<8x128xf32>
    %360 = arith.mulf %344, %352 : vector<8x128xf32>
    %361 = arith.addf %359, %360 : vector<8x128xf32>
    %362 = math.tanh %361 : vector<8x128xf32>
    %363 = arith.mulf %358, %362 : vector<8x128xf32>
    %364 = vector.broadcast %2 : vector<1x128xf32> to vector<8x128xf32>
    %365 = arith.mulf %363, %364 : vector<8x128xf32>
    %cst_101 = arith.constant dense<0.000000e+00> : vector<8xf32>
    %366 = vector.multi_reduction <add>, %365, %cst_101 [1] : vector<8x128xf32> to vector<8xf32>
    %367 = vector.shape_cast %366 : vector<8xf32> to vector<8x1xf32>
    %368 = vector.broadcast %3 : vector<1x1xf32> to vector<8x1xf32>
    %369 = arith.addf %367, %368 : vector<8x1xf32>
    %370 = vector.extract_strided_slice %369 {offsets = [0, 0], sizes = [2, 1], strides = [1, 1]} : vector<8x1xf32> to vector<2x1xf32>
    %c7_102 = arith.constant 7 : index
    %c0_103 = arith.constant 0 : index
    %c0_104 = arith.constant 0 : index
    %371 = vector.load %arg6[%c7_102, %c0_103, %c0_104] : memref<8x2x1xf32, #tpu.memory_space<vmem>>, vector<1x2x1xf32>
    %372 = vector.shape_cast %371 : vector<1x2x1xf32> to vector<2x1xf32>
    %373 = vector.shape_cast %370 : vector<2x1xf32> to vector<1x2x1xf32>
    tpu.vector_store %arg6[%c7_102, %c0_103, %c0_104], %373 {strides = array<i32>} : memref<8x2x1xf32, #tpu.memory_space<vmem>>, vector<1x2x1xf32>,
    return
  }
}

</mosaic_0001>

<bundles_post_ra>
// kernel: lstm_reg_forward.1
= control target key start
LH: loop header
LB: loop body
LE: loop exit
PB: predicated region body
PF: predicated region fallthrough
CT: control target
= control target key end

     0   :  { %s3921_s0 = inlined_call_operand.vmem [shape: f32[8,8,1], index: 0, kind: input, shape index: {}]   ;;  %s3922_s1 = inlined_call_operand.vmem [shape: f32[1,512], index: 1, kind: input, shape index: {}]   ;;  %s3923_s2 = inlined_call_operand.vmem [shape: f32[1,512], index: 2, kind: input, shape index: {}]   ;;  %s3924_s3 = inlined_call_operand.hbm [shape: bf16[128,512], index: 3, kind: input, shape index: {}]   ;;  %s3925_s4 = inlined_call_operand.vmem [shape: f32[1,128], index: 4, kind: input, shape index: {}]   ;;  %s3926_s5 = inlined_call_operand.<no memory space> [shape: f32[1,1], index: 5, kind: input, shape index: {}]   ;;  %s3927_s6 = inlined_call_operand.vmem [shape: f32[8,2,1], index: 6, kind: output, shape index: {}]  }
   0x1   :  { %v11_v0 = vstv %s3926_s5 }
   0x2   :  { %12 = vst [vmem:[#allocation2] sm:$0x1] %v11_v0 }
   0x3   :  { %13 = vsyncpa [#allocation4], 0  ;;  %s3245_s23 = smov [#allocation3]   ;;  %s3221_s27 = scalar_lea.hbm %s3924_s3, 4096 }
   0x4   :  { %s25_s24 = sshll.u32 %s3245_s23, 4  ;;  %p3222_p0 = scmp.ne.s32.totalorder %s3924_s3, %s3221_s27  ;;  %s26_s24 = int_to_ptr.vmem [resolvable:$true] %s25_s24 }
   0x5   :  { %p3225_p1 = scmp.lt.u32.totalorder %s3221_s27, %s3924_s3 }
   0x7   :  { %p3227_p2 = pnand %p3225_p1, %p3222_p0 }
   0x9   :  { %3230 = shalt.err (!%p3227_p2)
}
   0xa   :  { %s3231_s5 = scalar_lea.vmem %s26_s24, 4096  ;;  %p3236_p4 = scmp.lt.s32.totalorder %s26_s24, %s26_s24 }
   0xb   :  { %p3232_p3 = scmp.ne.s32.totalorder %s26_s24, %s3231_s5  ;;  %p3237_p5 = scmp.lt.s32.totalorder %s3231_s5, %s3231_s5 }
   0xd   :  { %p3238_p6 = por %p3237_p5, %p3236_p4 }
   0xf   :  { %p3239_p7 = pnand %p3238_p6, %p3232_p3 }
  0x11   :  { %3242 = shalt.err (!%p3239_p7)
}
  0x12   :  { %s3246_s8 = smov 256   ;;  %s3247_s9 = smov 16  }
  0x13   :  { %31 = dma.hbm_to_vmem [thread:$0]  %s3924_s3, 4096, %s26_s24, [#allocation4], %s3246_s8, %s3246_s8, %s3247_s9  }
  0x14   :  { %3243 = dma.done.wait [#allocation4], 4096  }
  0x15   :  { %3244 = vsyncadd [#allocation4], 4294963200  ;;  %v3928_v1 = vmov 0   ;;  %v3303_v2 = vld [vmem:[#allocation3 + $0x4] ss:$16 sps:$4 sm:$0xff]   ;;  %v51_v41 = vlaneseq  ;;  %vm418_vm0 = vcmask 1024  }
  0x16   :  { %324 = vmatprep.mubr.bf16.mxu0 %v3928_v1  ;;  %365 = vmatprep.mubr.bf16.mxu1 %v3928_v1  ;;  %v3305_v3 = vld [vmem:[#allocation3 + $0xc] ss:$16 sps:$4 sm:$0xff]   ;;  %v3308_v4 = vld [vmem:[#allocation3] ss:$16 sps:$4 sm:$0xff]   ;;  %v3310_v5 = vld [vmem:[#allocation3 + $0x8] ss:$16 sps:$4 sm:$0xff]  }
  0x17   :  { %2993 = vset.pattern.permute.xlu0 %v3928_v1  ;;  %2994 = vset.pattern.permute.xlu1 %v3928_v1  ;;  %v3313_v6 = vld [vmem:[#allocation3 + $0x24] ss:$16 sps:$4 sm:$0xff]   ;;  %v3317_v7 = vld [vmem:[#allocation3 + $0x2c] ss:$16 sps:$4 sm:$0xff]   ;;  %v3319_v8 = vld [vmem:[#allocation3 + $0x20] ss:$16 sps:$4 sm:$0xff]  }
  0x18   :  { %292 = vmatprep.subr.bf16.mxu0 %v3303_v2  ;;  %333 = vmatprep.subr.bf16.mxu1 %v3305_v3  ;;  %v3322_v9 = vld [vmem:[#allocation3 + $0x28] ss:$16 sps:$4 sm:$0xff]   ;;  %v3325_v10 = vld [vmem:[#allocation3 + $0x44] ss:$16 sps:$4 sm:$0xff]   ;;  %v3327_v11 = vld [vmem:[#allocation3 + $0x4c] ss:$16 sps:$4 sm:$0xff]  }
  0x19   :  { %293 = vmatpush1.bf16.msra.mxu0 %v3308_v4  ;;  %334 = vmatpush1.bf16.msra.mxu1 %v3310_v5  ;;  %v3329_v12 = vld [vmem:[#allocation3 + $0x40] ss:$16 sps:$4 sm:$0xff]   ;;  %v3331_v13 = vld [vmem:[#allocation3 + $0x48] ss:$16 sps:$4 sm:$0xff]   ;;  %v3335_v14 = vld [vmem:[#allocation3 + $0x64] ss:$16 sps:$4 sm:$0xff]  }
  0x1a   :  { %294 = vmatprep.subr.bf16.mxu0 %v3313_v6  ;;  %335 = vmatprep.subr.bf16.mxu1 %v3317_v7  ;;  %v3339_v15 = vld [vmem:[#allocation3 + $0x6c] ss:$16 sps:$4 sm:$0xff]   ;;  %v3341_v16 = vld [vmem:[#allocation3 + $0x60] ss:$16 sps:$4 sm:$0xff]   ;;  %v3345_v17 = vld [vmem:[#allocation3 + $0x68] ss:$16 sps:$4 sm:$0xff]  }
  0x1b   :  { %v3347_v18 = vld [vmem:[#allocation3 + $0x84] ss:$16 sps:$4 sm:$0xff]   ;;  %v3351_v19 = vld [vmem:[#allocation3 + $0x8c] ss:$16 sps:$4 sm:$0xff]   ;;  %v3353_v20 = vld [vmem:[#allocation3 + $0x80] ss:$16 sps:$4 sm:$0xff]  }
  0x1c   :  { %v3355_v21 = vld [vmem:[#allocation3 + $0x88] ss:$16 sps:$4 sm:$0xff]   ;;  %v3359_v22 = vld [vmem:[#allocation3 + $0xa4] ss:$16 sps:$4 sm:$0xff]   ;;  %v3363_v23 = vld [vmem:[#allocation3 + $0xac] ss:$16 sps:$4 sm:$0xff]  }
  0x1d   :  { %295 = vmatpush1.bf16.msra.mxu0 %v3319_v8  ;;  %336 = vmatpush1.bf16.msra.mxu1 %v3322_v9  ;;  %v3367_v24 = vld [vmem:[#allocation3 + $0xa0] ss:$16 sps:$4 sm:$0xff]   ;;  %v3369_v25 = vld [vmem:[#allocation3 + $0xa8] ss:$16 sps:$4 sm:$0xff]   ;;  %v3373_v26 = vld [vmem:[#allocation3 + $0xc4] ss:$16 sps:$4 sm:$0xff]  }
  0x1e   :  { %296 = vmatprep.subr.bf16.mxu0 %v3325_v10  ;;  %337 = vmatprep.subr.bf16.mxu1 %v3327_v11  ;;  %v3375_v27 = vld [vmem:[#allocation3 + $0xcc] ss:$16 sps:$4 sm:$0xff]   ;;  %v3380_v29 = vld [vmem:[#allocation3 + $0xc0] ss:$16 sps:$4 sm:$0xff]   ;;  %v3382_v30 = vld [vmem:[#allocation3 + $0xc8] ss:$16 sps:$4 sm:$0xff]  }
  0x1f   :  { %v44_v28 = vld [vmem:[%s3921_s0] sm:$0xff]  ;;  %v2730_v31 = vld [vmem:[%s3921_s0 + $0x8] sm:$0xff]  ;;  %v2915_v37 = vld [vmem:[%s3921_s0 + $0x30] sm:$0xff]  ;;  %v52_v42 = vshrl.u32 %v51_v41, 7 }
  0x20   :  { %47 = vperm.xlu0 %2993, %v44_v28   ;;  %v3387_v32 = vld [vmem:[#allocation3 + $0xe4] ss:$16 sps:$4 sm:$0xff]   ;;  %v3389_v33 = vld [vmem:[#allocation3 + $0xec] ss:$16 sps:$4 sm:$0xff]   ;;  %v3398_v35 = vld [vmem:[#allocation3 + $0xe0] ss:$16 sps:$4 sm:$0xff]  }
  0x21   :  { %297 = vmatpush1.bf16.msra.mxu0 %v3329_v12  ;;  %338 = vmatpush1.bf16.msra.mxu1 %v3331_v13  ;;  %v2841_v34 = vld [vmem:[%s3921_s0 + $0x20] sm:$0xff]  ;;  %v3400_v36 = vld [vmem:[#allocation3 + $0xe8] ss:$16 sps:$4 sm:$0xff]   ;;  %v2767_v38 = vld [vmem:[%s3921_s0 + $0x10] sm:$0xff]  ;;  %v53_v43 = vsub.s32 0, %v52_v42  ;;  %v57_v45 = vsub.s32 1, %v52_v42 }
  0x22   :  { %298 = vmatprep.subr.bf16.mxu0 %v3335_v14  ;;  %339 = vmatprep.subr.bf16.mxu1 %v3339_v15  ;;  %v2804_v39 = vld [vmem:[%s3921_s0 + $0x18] sm:$0xff]  ;;  %v2878_v40 = vld [vmem:[%s3921_s0 + $0x28] sm:$0xff]  ;;  %v40_v44 = vld [vmem:[%s3922_s1] sm:$0xf]  ;;  %v65_v50 = vsub.s32 3, %v52_v42  ;;  %v61_v57 = vsub.s32 2, %v52_v42 }
  0x23   :  { %748 = vperm.xlu1 %2994, %v2767_v38   ;;  %v3461_v46 = vrot.slane %v40_v44, %v53_v43  ;;  %v41_v47 = vld [vmem:[%s3923_s2] sm:$0xf]  ;;  %v3466_v48 = vrot.slane %v40_v44, %v57_v45 }
  0x24   :  { %424 = vperm.xlu0 %2993, %v2730_v31   ;;  %v3469_v52 = vrot.slane %v41_v47, %v53_v43  ;;  %v3472_v54 = vrot.slane %v41_v47, %v57_v45  ;;  %v3474_v55 = vrot.slane %v40_v44, %v65_v50  ;;  %v3479_v62 = vrot.slane %v41_v47, %v65_v50 }
  0x25   :  { %299 = vmatpush1.bf16.msra.mxu0 %v3341_v16  ;;  %340 = vmatpush1.bf16.msra.mxu1 %v3345_v17  ;;  %v3481_v0 = vrot.slane %v40_v44, %v61_v57 }
  0x26   :  { %300 = vmatprep.subr.bf16.mxu0 %v3347_v18  ;;  %341 = vmatprep.subr.bf16.mxu1 %v3351_v19  ;;  %3940 = vst [vmem:[#allocation6_spill] sm:$0xff] %v3472_v54  ;;  %3941 = vst [vmem:[#allocation7_spill] sm:$0xff] %v3474_v55 }
  0x27   :  { %1072 = vperm.xlu1 %2994, %v2804_v39   ;;  %3942 = vst [vmem:[#allocation8_spill] sm:$0xff] %v3481_v0 }
  0x28   :  { %1396 = vperm.xlu0 %2993, %v2841_v34  }
  0x29   :  { %301 = vmatpush1.bf16.msra.mxu0 %v3353_v20  ;;  %342 = vmatpush1.bf16.msra.mxu1 %v3355_v21 }
  0x2a   :  { %302 = vmatprep.subr.bf16.mxu0 %v3359_v22  ;;  %343 = vmatprep.subr.bf16.mxu1 %v3363_v23 }
  0x2b   :  { %1720 = vperm.xlu1 %2994, %v2878_v40  }
  0x2c   :  { %2044 = vperm.xlu0 %2993, %v2915_v37  }
  0x2d   :  { %303 = vmatpush1.bf16.msra.mxu0 %v3367_v24  ;;  %344 = vmatpush1.bf16.msra.mxu1 %v3369_v25 }
  0x2e   :  { %304 = vmatprep.subr.bf16.mxu0 %v3373_v26  ;;  %345 = vmatprep.subr.bf16.mxu1 %v3375_v27 }
  0x31   :  { %305 = vmatpush1.bf16.msra.mxu0 %v3380_v29  ;;  %346 = vmatpush1.bf16.msra.mxu1 %v3382_v30 }
  0x32   :  { %306 = vmatprep.subr.bf16.mxu0 %v3387_v32  ;;  %347 = vmatprep.subr.bf16.mxu1 %v3389_v33 }
  0x35   :  { %307 = vmatpush1.bf16.msra.mxu0 %v3398_v35  ;;  %348 = vmatpush1.bf16.msra.mxu1 %v3400_v36 }
  0x36   :  { %628 = vmatprep.subr.bf16.mxu0 %v3303_v2  ;;  %669 = vmatprep.subr.bf16.mxu1 %v3305_v3 }
  0x38   :  { %325 = vmatmul.mubr.bf16.vlgmr.msra.gmra.mrb[0].mxu0 %v3928_v1  ;;  %366 = vmatmul.mubr.bf16.vlgmr.msra.gmra.mrb[0].mxu1 %v3928_v1 }
  0x39   :  { %629 = vmatpush1.bf16.msra.mxu0 %v3308_v4  ;;  %670 = vmatpush1.bf16.msra.mxu1 %v3310_v5 }
  0x3a   :  { %630 = vmatprep.subr.bf16.mxu0 %v3313_v6  ;;  %671 = vmatprep.subr.bf16.mxu1 %v3317_v7 }
  0x3b   :  { %660 = vmatprep.mubr.bf16.mxu0 %v3928_v1  ;;  %701 = vmatprep.mubr.bf16.mxu1 %v3928_v1 }
  0x3d   :  { %631 = vmatpush1.bf16.msra.mxu0 %v3319_v8  ;;  %672 = vmatpush1.bf16.msra.mxu1 %v3322_v9 }
  0x3e   :  { %632 = vmatprep.subr.bf16.mxu0 %v3325_v10  ;;  %673 = vmatprep.subr.bf16.mxu1 %v3327_v11 }
  0x41   :  { %633 = vmatpush1.bf16.msra.mxu0 %v3329_v12  ;;  %674 = vmatpush1.bf16.msra.mxu1 %v3331_v13 }
  0x42   :  { %634 = vmatprep.subr.bf16.mxu0 %v3335_v14  ;;  %675 = vmatprep.subr.bf16.mxu1 %v3339_v15 }
  0x45   :  { %635 = vmatpush1.bf16.msra.mxu0 %v3341_v16  ;;  %676 = vmatpush1.bf16.msra.mxu1 %v3345_v17 }
  0x46   :  { %636 = vmatprep.subr.bf16.mxu0 %v3347_v18  ;;  %677 = vmatprep.subr.bf16.mxu1 %v3351_v19 }
  0x49   :  { %637 = vmatpush1.bf16.msra.mxu0 %v3353_v20  ;;  %678 = vmatpush1.bf16.msra.mxu1 %v3355_v21 }
  0x4a   :  { %638 = vmatprep.subr.bf16.mxu0 %v3359_v22  ;;  %679 = vmatprep.subr.bf16.mxu1 %v3363_v23 }
  0x4d   :  { %639 = vmatpush1.bf16.msra.mxu0 %v3367_v24  ;;  %680 = vmatpush1.bf16.msra.mxu1 %v3369_v25 }
  0x4e   :  { %640 = vmatprep.subr.bf16.mxu0 %v3373_v26  ;;  %681 = vmatprep.subr.bf16.mxu1 %v3375_v27 }
  0x51   :  { %641 = vmatpush1.bf16.msra.mxu0 %v3380_v29  ;;  %682 = vmatpush1.bf16.msra.mxu1 %v3382_v30 }
  0x52   :  { %642 = vmatprep.subr.bf16.mxu0 %v3387_v32  ;;  %683 = vmatprep.subr.bf16.mxu1 %v3389_v33 }
  0x55   :  { %643 = vmatpush1.bf16.msra.mxu0 %v3398_v35  ;;  %684 = vmatpush1.bf16.msra.mxu1 %v3400_v36 }
  0x56   :  { %952 = vmatprep.subr.bf16.mxu0 %v3303_v2  ;;  %993 = vmatprep.subr.bf16.mxu1 %v3305_v3 }
  0x9f   :  { %v48_v49 = vpop.permute.xlu0 %47 }
  0xa0   :  { %v71_v51 = vmul.f32 %v3461_v46, %v48_v49  ;;  %v72_v53 = vmul.f32 %v3466_v48, %v48_v49  ;;  %v74_v61 = vmul.f32 %v3474_v55, %v48_v49  ;;  %v73_v45 = vmul.f32 %v3481_v0, %v48_v49 }
  0xa2   :  { %v96_v56 = vadd.f32 %v3469_v52, %v71_v51  ;;  %v97_v58 = vadd.f32 %v3472_v54, %v72_v53  ;;  %v99_v43 = vadd.f32 %v3479_v62, %v74_v61  ;;  %v3485_v51 = vrot.slane %v41_v47, %v61_v57 }
  0xa4   :  { %3943 = vst [vmem:[#allocation9_spill] sm:$0xff] %v3485_v51  ;;  %v98_v44 = vadd.f32 %v3485_v51, %v73_v45  ;;  %v3531_v45 = vpop.permute.xlu1 %748 }
 0x10b   :  { %v326_v59 = vpop.f32.mrb[0].mxu0  ;;  %v367_v60 = vpop.f32.mrb[0].mxu1 }
 0x10c   :  { %v374_v63 = vadd.f32 %v326_v59, %v96_v56  ;;  %v328_v28 = vpop.f32.mrb[1].mxu0  ;;  %v369_v31 = vpop.f32.mrb[1].mxu1  ;;  %v376_v56 = vadd.f32 %v367_v60, %v98_v44 }
 0x10d   :  { %v375_v34 = vadd.f32 %v328_v28, %v97_v58  ;;  %v330_v37 = vpop.f32.mrb[2].mxu0  ;;  %v371_v38 = vpop.f32.mrb[2].mxu1  ;;  %v377_v50 = vadd.f32 %v369_v31, %v99_v43 }
 0x10e   :  { %v2725_v39 = vmul.f32 -1.442695, %v374_v63  ;;  %v331_v40 = vpop.f32.mrb[3].mxu0  ;;  %v372_v41 = vpop.f32.mrb[3].mxu1 }
 0x10f   :  { %v2726_v42 = vmul.f32 -1.442695, %v375_v34  ;;  %v2727_v53 = vmul.f32 -1.442695, %v377_v50  ;;  %v3494_v40 = vld [vmem:[%s3925_s4] ss:$0 sm:$0xff]  ;;  %v3533_v50 = vpop.permute.xlu1 %1072 }
 0x110   :  { %3091 = vpow2.f32 %v2725_v39 }
 0x111   :  { %3093 = vpow2.f32 %v2726_v42 }
 0x112   :  { %3095 = vpow2.f32 %v2727_v53  ;;  %v3537_v53 = vld [vmem:[#allocation2] ss:$0 sm:$0xff] }
 0x113   :  { %3097 = vtanh.f32 %v376_v56  ;;  %v3535_v44 = vpop.permute.xlu1 %1720 }
 0x114   :  { %3944 = vst [vmem:[#allocation10_spill] sm:$0xff] %v3535_v44 }
 0x11a   :  { %v3092_v58 = vpop.eup %3091 }
 0x11b   :  { %v3094_v59 = vpop.eup %3093  ;;  %v381_v28 = vadd.f32 1.0, %v3092_v58 }
 0x11c   :  { %v387_v63 = vadd.f32 1.0, %v3094_v59  ;;  %v3096_v61 = vpop.eup %3095 }
 0x11d   :  { %3099 = vrcp.f32 %v381_v28  ;;  %v3098_v34 = vpop.eup %3097  ;;  %v394_v57 = vadd.f32 1.0, %v3096_v61 }
 0x11e   :  { %3101 = vrcp.f32 %v387_v63 }
 0x11f   :  { %3103 = vrcp.f32 %v394_v57 }
 0x127   :  { %v3100_v37 = vpop.eup %3099 }
 0x128   :  { %v3102_v49 = vpop.eup %3101  ;;  %v398_v47 = vmul.f32 %v3100_v37, %v3098_v34 }
 0x129   :  { %v397_v38 = vmul.f32 0.0, %v3102_v49  ;;  %v3104_v60 = vpop.eup %3103 }
 0x12b   :  { %v3488_v31 = vadd.f32 %v398_v47, %v397_v38 }
 0x12d   :  { %3105 = vtanh.f32 %v3488_v31 }
 0x137   :  { %v3106_v39 = vpop.eup %3105 }
 0x138   :  { %v401_v41 = vmul.f32 %v3106_v39, %v3104_v60 }
 0x13a   :  { %v435_v42 = vpack.c.bf16 %v401_v41, %v401_v41  ;;  %v408_v43 = vmul.f32 %v3494_v40, %v401_v41 }
 0x13c   :  { %661 = vmatmul.mubr.bf16.vlgmr.msra.gmra.mrb[4].mxu0 %v435_v42  ;;  %702 = vmatmul.mubr.bf16.vlgmr.msra.gmra.mrb[4].mxu1 %v435_v42 }
 0x13d   :  { %409 = vadd.xlane.f32.xlu1 %v408_v43  ;;  %953 = vmatpush1.bf16.msra.mxu0 %v3308_v4 }
 0x13e   :  { %994 = vmatpush1.bf16.msra.mxu1 %v3310_v5  ;;  %954 = vmatprep.subr.bf16.mxu0 %v3313_v6 }
 0x13f   :  { %995 = vmatprep.subr.bf16.mxu1 %v3317_v7  ;;  %984 = vmatprep.mubr.bf16.mxu0 %v3928_v1 }
 0x140   :  { %1025 = vmatprep.mubr.bf16.mxu1 %v3928_v1 }
 0x141   :  { %955 = vmatpush1.bf16.msra.mxu0 %v3319_v8 }
 0x142   :  { %996 = vmatpush1.bf16.msra.mxu1 %v3322_v9  ;;  %956 = vmatprep.subr.bf16.mxu0 %v3325_v10 }
 0x143   :  { %997 = vmatprep.subr.bf16.mxu1 %v3327_v11 }
 0x145   :  { %957 = vmatpush1.bf16.msra.mxu0 %v3329_v12 }
 0x146   :  { %998 = vmatpush1.bf16.msra.mxu1 %v3331_v13  ;;  %958 = vmatprep.subr.bf16.mxu0 %v3335_v14 }
 0x147   :  { %999 = vmatprep.subr.bf16.mxu1 %v3339_v15 }
 0x149   :  { %959 = vmatpush1.bf16.msra.mxu0 %v3341_v16 }
 0x14a   :  { %1000 = vmatpush1.bf16.msra.mxu1 %v3345_v17  ;;  %960 = vmatprep.subr.bf16.mxu0 %v3347_v18 }
 0x14b   :  { %1001 = vmatprep.subr.bf16.mxu1 %v3351_v19 }
 0x14d   :  { %961 = vmatpush1.bf16.msra.mxu0 %v3353_v20 }
 0x14e   :  { %1002 = vmatpush1.bf16.msra.mxu1 %v3355_v21  ;;  %962 = vmatprep.subr.bf16.mxu0 %v3359_v22 }
 0x14f   :  { %1003 = vmatprep.subr.bf16.mxu1 %v3363_v23 }
 0x151   :  { %963 = vmatpush1.bf16.msra.mxu0 %v3367_v24 }
 0x152   :  { %1004 = vmatpush1.bf16.msra.mxu1 %v3369_v25  ;;  %964 = vmatprep.subr.bf16.mxu0 %v3373_v26 }
 0x153   :  { %1005 = vmatprep.subr.bf16.mxu1 %v3375_v27 }
 0x155   :  { %965 = vmatpush1.bf16.msra.mxu0 %v3380_v29 }
 0x156   :  { %1006 = vmatpush1.bf16.msra.mxu1 %v3382_v30  ;;  %966 = vmatprep.subr.bf16.mxu0 %v3387_v32 }
 0x157   :  { %1007 = vmatprep.subr.bf16.mxu1 %v3389_v33 }
 0x159   :  { %967 = vmatpush1.bf16.msra.mxu0 %v3398_v35 }
 0x15a   :  { %1008 = vmatpush1.bf16.msra.mxu1 %v3400_v36  ;;  %1276 = vmatprep.subr.bf16.mxu0 %v3303_v2  ;;  %v425_v2 = vpop.permute.xlu0 %424 }
 0x15b   :  { %1317 = vmatprep.subr.bf16.mxu1 %v3305_v3  ;;  %v427_v3 = vmul.f32 %v425_v2, %v3461_v46  ;;  %v428_v59 = vmul.f32 %v425_v2, %v3466_v48  ;;  %v430_v38 = vmul.f32 %v425_v2, %v3474_v55 }
 0x15d   :  { %v431_v28 = vadd.f32 %v427_v3, %v3469_v52  ;;  %v432_v34 = vadd.f32 %v428_v59, %v3472_v54  ;;  %v429_v3 = vmul.f32 %v425_v2, %v3481_v0 }
 0x15f   :  { %v433_v59 = vadd.f32 %v429_v3, %v3485_v51 }
 0x1ca   :  { %v410_v56 = vpop.xlane.xlu1 %409 }
 0x1cb   :  { %v417_v58 = vadd.f32 %v3537_v53, %v410_v56 }
 0x1cd   :  { %419 = vst.msk [vmem:[%s3927_s6] sm:$0x3] %vm418_vm0, %v417_v58  ;;  %v434_v58 = vadd.f32 %v430_v38, %v3479_v62 }
 0x20f   :  { %v662_v63 = vpop.f32.mrb[4].mxu0  ;;  %v703_v61 = vpop.f32.mrb[4].mxu1 }
 0x210   :  { %v710_v37 = vadd.f32 %v662_v63, %v431_v28  ;;  %v664_v49 = vpop.f32.mrb[5].mxu0  ;;  %v705_v47 = vpop.f32.mrb[5].mxu1  ;;  %v712_v63 = vadd.f32 %v703_v61, %v433_v59 }
 0x211   :  { %v711_v57 = vadd.f32 %v664_v49, %v432_v34  ;;  %v666_v60 = vpop.f32.mrb[6].mxu0  ;;  %v707_v39 = vpop.f32.mrb[6].mxu1  ;;  %v713_v1 = vadd.f32 %v705_v47, %v434_v58 }
 0x212   :  { %v2763_v41 = vmul.f32 -1.442695, %v710_v37  ;;  %v667_v42 = vpop.f32.mrb[7].mxu0  ;;  %v708_v43 = vpop.f32.mrb[7].mxu1 }
 0x213   :  { %v2764_v56 = vmul.f32 -1.442695, %v711_v57  ;;  %v2765_v28 = vmul.f32 -1.442695, %v713_v1 }
 0x214   :  { %3107 = vpow2.f32 %v2763_v41 }
 0x215   :  { %3109 = vpow2.f32 %v2764_v56 }
 0x216   :  { %3111 = vpow2.f32 %v2765_v28 }
 0x217   :  { %3113 = vtanh.f32 %v712_v63 }
 0x21e   :  { %v3108_v34 = vpop.eup %3107 }
 0x21f   :  { %v3110_v49 = vpop.eup %3109  ;;  %v717_v44 = vadd.f32 1.0, %v3108_v34 }
 0x220   :  { %v723_v37 = vadd.f32 1.0, %v3110_v49  ;;  %v3112_v57 = vpop.eup %3111 }
 0x221   :  { %3115 = vrcp.f32 %v717_v44  ;;  %v3114_v60 = vpop.eup %3113  ;;  %v730_v42 = vadd.f32 1.0, %v3112_v57 }
 0x222   :  { %3117 = vrcp.f32 %v723_v37 }
 0x223   :  { %3119 = vrcp.f32 %v730_v42  ;;  %v3617_v42 = vld [vmem:[#allocation3 + $0x4] ss:$16 sps:$4 sm:$0xff]  }
 0x22b   :  { %v3116_v39 = vpop.eup %3115 }
 0x22c   :  { %v3118_v41 = vpop.eup %3117  ;;  %v734_v38 = vmul.f32 %v3116_v39, %v3114_v60 }
 0x22d   :  { %v733_v2 = vmul.f32 %v3118_v41, %v3488_v31  ;;  %v3120_v1 = vpop.eup %3119  ;;  %v3945_v31 = vmov 0  }
 0x22f   :  { %v3553_v47 = vadd.f32 %v734_v38, %v733_v2  ;;  %v3619_v2 = vld [vmem:[#allocation3 + $0xc] ss:$16 sps:$4 sm:$0xff]  }
 0x231   :  { %3121 = vtanh.f32 %v3553_v47 }
 0x23b   :  { %v3122_v61 = vpop.eup %3121 }
 0x23c   :  { %v737_v43 = vmul.f32 %v3122_v61, %v3120_v1  ;;  %v3623_v1 = vld [vmem:[#allocation3 + $0x8] ss:$16 sps:$4 sm:$0xff]   ;;  %v3629_v61 = vld [vmem:[#allocation3 + $0x24] ss:$16 sps:$4 sm:$0xff]  }
 0x23e   :  { %v759_v56 = vpack.c.bf16 %v737_v43, %v737_v43  ;;  %v738_v44 = vmul.f32 %v3494_v40, %v737_v43  ;;  %v3631_v43 = vld [vmem:[#allocation3 + $0x2c] ss:$16 sps:$4 sm:$0xff]  }
 0x240   :  { %985 = vmatmul.mubr.bf16.vlgmr.msra.gmra.mrb[8].mxu0 %v759_v56  ;;  %1026 = vmatmul.mubr.bf16.vlgmr.msra.gmra.mrb[8].mxu1 %v759_v56  ;;  %v3633_v56 = vld [vmem:[#allocation3 + $0x20] ss:$16 sps:$4 sm:$0xff]  }
 0x241   :  { %739 = vadd.xlane.f32.xlu0 %v738_v44  ;;  %1277 = vmatpush1.bf16.msra.mxu0 %v3308_v4  ;;  %v3589_v4 = vpop.permute.xlu0 %1396  ;;  %v3635_v44 = vld [vmem:[#allocation3 + $0x28] ss:$16 sps:$4 sm:$0xff]  }
 0x242   :  { %1318 = vmatpush1.bf16.msra.mxu1 %v3310_v5  ;;  %1278 = vmatprep.subr.bf16.mxu0 %v3313_v6 }
 0x243   :  { %1319 = vmatprep.subr.bf16.mxu1 %v3317_v7  ;;  %1308 = vmatprep.mubr.bf16.mxu0 %v3945_v31 }
 0x244   :  { %1349 = vmatprep.mubr.bf16.mxu1 %v3945_v31 }
 0x245   :  { %1279 = vmatpush1.bf16.msra.mxu0 %v3319_v8  ;;  %v3591_v5 = vpop.permute.xlu0 %2044  ;;  %v751_v8 = vmul.f32 %v3531_v45, %v3461_v46 }
 0x246   :  { %1320 = vmatpush1.bf16.msra.mxu1 %v3322_v9  ;;  %1280 = vmatprep.subr.bf16.mxu0 %v3325_v10  ;;  %3946 = vst [vmem:[#allocation11_spill] sm:$0xff] %v3591_v5  ;;  %v752_v9 = vmul.f32 %v3531_v45, %v3466_v48 }
 0x247   :  { %1321 = vmatprep.subr.bf16.mxu1 %v3327_v11  ;;  %v755_v10 = vadd.f32 %v751_v8, %v3469_v52  ;;  %v3645_v8 = vld [vmem:[#allocation3 + $0x40] ss:$16 sps:$4 sm:$0xff]  }
 0x248   :  { %v756_v11 = vadd.f32 %v752_v9, %v3472_v54  ;;  %v3647_v9 = vld [vmem:[#allocation3 + $0x48] ss:$16 sps:$4 sm:$0xff]  }
 0x249   :  { %1281 = vmatpush1.bf16.msra.mxu0 %v3329_v12 }
 0x24a   :  { %1322 = vmatpush1.bf16.msra.mxu1 %v3331_v13  ;;  %1282 = vmatprep.subr.bf16.mxu0 %v3335_v14  ;;  %v754_v14 = vmul.f32 %v3531_v45, %v3474_v55 }
 0x24b   :  { %1323 = vmatprep.subr.bf16.mxu1 %v3339_v15 }
 0x24d   :  { %1283 = vmatpush1.bf16.msra.mxu0 %v3341_v16 }
 0x24e   :  { %1324 = vmatpush1.bf16.msra.mxu1 %v3345_v17  ;;  %1284 = vmatprep.subr.bf16.mxu0 %v3347_v18 }
 0x24f   :  { %1325 = vmatprep.subr.bf16.mxu1 %v3351_v19 }
 0x251   :  { %1285 = vmatpush1.bf16.msra.mxu0 %v3353_v20 }
 0x252   :  { %1326 = vmatpush1.bf16.msra.mxu1 %v3355_v21  ;;  %1286 = vmatprep.subr.bf16.mxu0 %v3359_v22 }
 0x253   :  { %1327 = vmatprep.subr.bf16.mxu1 %v3363_v23 }
 0x255   :  { %1287 = vmatpush1.bf16.msra.mxu0 %v3367_v24 }
 0x256   :  { %1328 = vmatpush1.bf16.msra.mxu1 %v3369_v25  ;;  %1288 = vmatprep.subr.bf16.mxu0 %v3373_v26  ;;  %v758_v25 = vadd.f32 %v754_v14, %v3479_v62  ;;  %v753_v26 = vmul.f32 %v3531_v45, %v3481_v0  ;;  %v3665_v14 = vld [vmem:[#allocation3 + $0x84] ss:$16 sps:$4 sm:$0xff]  }
 0x257   :  { %1329 = vmatprep.subr.bf16.mxu1 %v3375_v27 }
 0x259   :  { %1289 = vmatpush1.bf16.msra.mxu0 %v3380_v29  ;;  %v757_v29 = vadd.f32 %v753_v26, %v3485_v51  ;;  %v3699_v26 = vld [vmem:[#allocation3 + $0xe4] ss:$16 sps:$4 sm:$0xff]  }
 0x25a   :  { %1330 = vmatpush1.bf16.msra.mxu1 %v3382_v30  ;;  %1290 = vmatprep.subr.bf16.mxu0 %v3387_v32 }
 0x25b   :  { %1331 = vmatprep.subr.bf16.mxu1 %v3389_v33 }
 0x25d   :  { %1291 = vmatpush1.bf16.msra.mxu0 %v3398_v35 }
 0x25e   :  { %1332 = vmatpush1.bf16.msra.mxu1 %v3400_v36  ;;  %1600 = vmatprep.subr.bf16.mxu0 %v3617_v42 }
 0x25f   :  { %1641 = vmatprep.subr.bf16.mxu1 %v3619_v2 }
 0x2ce   :  { %v740_v6 = vpop.xlane.xlu0 %739 }
 0x2cf   :  { %v741_v7 = vadd.f32 %v3537_v53, %v740_v6  ;;  %v3641_v6 = vld [vmem:[#allocation3 + $0x44] ss:$16 sps:$4 sm:$0xff]  }
 0x2d1   :  { %2766 = vst.msk [vmem:[%s3927_s6 + $0x2] sm:$0x3] %vm418_vm0, %v741_v7  ;;  %v3643_v7 = vld [vmem:[#allocation3 + $0x4c] ss:$16 sps:$4 sm:$0xff]  }
 0x313   :  { %v986_v12 = vpop.f32.mrb[8].mxu0  ;;  %v1027_v13 = vpop.f32.mrb[8].mxu1 }
 0x314   :  { %v1034_v15 = vadd.f32 %v986_v12, %v755_v10  ;;  %v988_v16 = vpop.f32.mrb[9].mxu0  ;;  %v1029_v17 = vpop.f32.mrb[9].mxu1  ;;  %v1036_v32 = vadd.f32 %v1027_v13, %v757_v29  ;;  %v3653_v10 = vld [vmem:[#allocation3 + $0x64] ss:$16 sps:$4 sm:$0xff]   ;;  %v3657_v12 = vld [vmem:[#allocation3 + $0x60] ss:$16 sps:$4 sm:$0xff]  }
 0x315   :  { %v1035_v18 = vadd.f32 %v988_v16, %v756_v11  ;;  %v990_v19 = vpop.f32.mrb[10].mxu0  ;;  %v1031_v20 = vpop.f32.mrb[10].mxu1  ;;  %v1037_v27 = vadd.f32 %v1029_v17, %v758_v25  ;;  %v3655_v11 = vld [vmem:[#allocation3 + $0x6c] ss:$16 sps:$4 sm:$0xff]   ;;  %v3659_v13 = vld [vmem:[#allocation3 + $0x68] ss:$16 sps:$4 sm:$0xff]  }
 0x316   :  { %v2800_v21 = vmul.f32 -1.442695, %v1034_v15  ;;  %v991_v22 = vpop.f32.mrb[11].mxu0  ;;  %v1032_v23 = vpop.f32.mrb[11].mxu1  ;;  %v3667_v15 = vld [vmem:[#allocation3 + $0x8c] ss:$16 sps:$4 sm:$0xff]  }
 0x317   :  { %v2801_v24 = vmul.f32 -1.442695, %v1035_v18  ;;  %v2802_v30 = vmul.f32 -1.442695, %v1037_v27  ;;  %v3669_v16 = vld [vmem:[#allocation3 + $0x80] ss:$16 sps:$4 sm:$0xff]  }
 0x318   :  { %3123 = vpow2.f32 %v2800_v21  ;;  %v3671_v17 = vld [vmem:[#allocation3 + $0x88] ss:$16 sps:$4 sm:$0xff]   ;;  %v3675_v18 = vld [vmem:[#allocation3 + $0xa4] ss:$16 sps:$4 sm:$0xff]   ;;  %v3679_v19 = vld [vmem:[#allocation3 + $0xa0] ss:$16 sps:$4 sm:$0xff]  }
 0x319   :  { %3125 = vpow2.f32 %v2801_v24  ;;  %v3681_v20 = vld [vmem:[#allocation3 + $0xa8] ss:$16 sps:$4 sm:$0xff]   ;;  %v3683_v21 = vld [vmem:[#allocation3 + $0xac] ss:$16 sps:$4 sm:$0xff]   ;;  %v3686_v22 = vld [vmem:[#allocation3 + $0xc4] ss:$16 sps:$4 sm:$0xff]  }
 0x31a   :  { %3127 = vpow2.f32 %v2802_v30  ;;  %v3688_v23 = vld [vmem:[#allocation3 + $0xcc] ss:$16 sps:$4 sm:$0xff]   ;;  %v3693_v24 = vld [vmem:[#allocation3 + $0xc0] ss:$16 sps:$4 sm:$0xff]   ;;  %v3695_v25 = vld [vmem:[#allocation3 + $0xc8] ss:$16 sps:$4 sm:$0xff]  }
 0x31b   :  { %3129 = vtanh.f32 %v1036_v32  ;;  %v3701_v27 = vld [vmem:[#allocation3 + $0xec] ss:$16 sps:$4 sm:$0xff]   ;;  %v3705_v29 = vld [vmem:[#allocation3 + $0xe0] ss:$16 sps:$4 sm:$0xff]   ;;  %v3707_v30 = vld [vmem:[#allocation3 + $0xe8] ss:$16 sps:$4 sm:$0xff]  }
 0x322   :  { %v3124_v33 = vpop.eup %3123 }
 0x323   :  { %v3126_v35 = vpop.eup %3125  ;;  %v1041_v36 = vadd.f32 1.0, %v3124_v33 }
 0x324   :  { %v1047_v58 = vadd.f32 1.0, %v3126_v35  ;;  %v3128_v3 = vpop.eup %3127  ;;  %v1075_v35 = vmul.f32 %v3533_v50, %v3461_v46 }
 0x325   :  { %3131 = vrcp.f32 %v1041_v36  ;;  %v3130_v59 = vpop.eup %3129  ;;  %v1054_v45 = vadd.f32 1.0, %v3128_v3  ;;  %v1076_v36 = vmul.f32 %v3533_v50, %v3466_v48 }
 0x326   :  { %3133 = vrcp.f32 %v1047_v58  ;;  %v1079_v58 = vadd.f32 %v1075_v35, %v3469_v52 }
 0x327   :  { %3135 = vrcp.f32 %v1054_v45 }
 0x32f   :  { %v3132_v28 = vpop.eup %3131 }
 0x330   :  { %v3134_v63 = vpop.eup %3133  ;;  %v1058_v34 = vmul.f32 %v3132_v28, %v3130_v59  ;;  %v1080_v28 = vadd.f32 %v1076_v36, %v3472_v54  ;;  %v1077_v36 = vmul.f32 %v3533_v50, %v3481_v0 }
 0x331   :  { %v1057_v49 = vmul.f32 %v3134_v63, %v3553_v47  ;;  %v3136_v57 = vpop.eup %3135  ;;  %v3621_v47 = vld [vmem:[#allocation3] ss:$16 sps:$4 sm:$0xff]  }
 0x333   :  { %v3611_v37 = vadd.f32 %v1058_v34, %v1057_v49 }
 0x335   :  { %3137 = vtanh.f32 %v3611_v37 }
 0x33f   :  { %v3138_v60 = vpop.eup %3137 }
 0x340   :  { %v1061_v39 = vmul.f32 %v3138_v60, %v3136_v57  ;;  %v1078_v57 = vmul.f32 %v3533_v50, %v3474_v55 }
 0x342   :  { %v1083_v41 = vpack.c.bf16 %v1061_v39, %v1061_v39  ;;  %v1062_v38 = vmul.f32 %v3494_v40, %v1061_v39  ;;  %v1082_v35 = vadd.f32 %v1078_v57, %v3479_v62 }
 0x344   :  { %1309 = vmatmul.mubr.bf16.vlgmr.msra.gmra.mrb[12].mxu0 %v1083_v41  ;;  %1350 = vmatmul.mubr.bf16.vlgmr.msra.gmra.mrb[12].mxu1 %v1083_v41 }
 0x345   :  { %1063 = vadd.xlane.f32.xlu0 %v1062_v38  ;;  %1632 = vmatprep.mubr.bf16.mxu0 %v3945_v31 }
 0x346   :  { %1673 = vmatprep.mubr.bf16.mxu1 %v3945_v31  ;;  %1601 = vmatpush1.bf16.msra.mxu0 %v3621_v47 }
 0x347   :  { %1642 = vmatpush1.bf16.msra.mxu1 %v3623_v1  ;;  %1602 = vmatprep.subr.bf16.mxu0 %v3629_v61 }
 0x348   :  { %1643 = vmatprep.subr.bf16.mxu1 %v3631_v43 }
 0x34a   :  { %1603 = vmatpush1.bf16.msra.mxu0 %v3633_v56 }
 0x34b   :  { %1644 = vmatpush1.bf16.msra.mxu1 %v3635_v44  ;;  %1604 = vmatprep.subr.bf16.mxu0 %v3641_v6 }
 0x34c   :  { %1645 = vmatprep.subr.bf16.mxu1 %v3643_v7 }
 0x34e   :  { %1605 = vmatpush1.bf16.msra.mxu0 %v3645_v8 }
 0x34f   :  { %1646 = vmatpush1.bf16.msra.mxu1 %v3647_v9  ;;  %1606 = vmatprep.subr.bf16.mxu0 %v3653_v10 }
 0x350   :  { %1647 = vmatprep.subr.bf16.mxu1 %v3655_v11 }
 0x352   :  { %1607 = vmatpush1.bf16.msra.mxu0 %v3657_v12 }
 0x353   :  { %1648 = vmatpush1.bf16.msra.mxu1 %v3659_v13  ;;  %1608 = vmatprep.subr.bf16.mxu0 %v3665_v14 }
 0x354   :  { %1649 = vmatprep.subr.bf16.mxu1 %v3667_v15 }
 0x356   :  { %1609 = vmatpush1.bf16.msra.mxu0 %v3669_v16 }
 0x357   :  { %1650 = vmatpush1.bf16.msra.mxu1 %v3671_v17  ;;  %1610 = vmatprep.subr.bf16.mxu0 %v3675_v18 }
 0x358   :  { %1651 = vmatprep.subr.bf16.mxu1 %v3683_v21 }
 0x35a   :  { %1611 = vmatpush1.bf16.msra.mxu0 %v3679_v19 }
 0x35b   :  { %1652 = vmatpush1.bf16.msra.mxu1 %v3681_v20  ;;  %1612 = vmatprep.subr.bf16.mxu0 %v3686_v22 }
 0x35c   :  { %1653 = vmatprep.subr.bf16.mxu1 %v3688_v23 }
 0x35e   :  { %1613 = vmatpush1.bf16.msra.mxu0 %v3693_v24 }
 0x35f   :  { %1654 = vmatpush1.bf16.msra.mxu1 %v3695_v25  ;;  %1614 = vmatprep.subr.bf16.mxu0 %v3699_v26 }
 0x360   :  { %1655 = vmatprep.subr.bf16.mxu1 %v3701_v27 }
 0x362   :  { %1615 = vmatpush1.bf16.msra.mxu0 %v3705_v29 }
 0x363   :  { %1656 = vmatpush1.bf16.msra.mxu1 %v3707_v30  ;;  %1924 = vmatprep.subr.bf16.mxu0 %v3617_v42 }
 0x364   :  { %1965 = vmatprep.subr.bf16.mxu1 %v3619_v2 }
 0x3d2   :  { %v1064_v32 = vpop.xlane.xlu0 %1063 }
 0x3d3   :  { %v1065_v33 = vadd.f32 %v3537_v53, %v1064_v32 }
 0x3d5   :  { %2803 = vst.msk [vmem:[%s3927_s6 + $0x4] sm:$0x3] %vm418_vm0, %v1065_v33 }
 0x417   :  { %v1310_v3 = vpop.f32.mrb[12].mxu0  ;;  %v1351_v59 = vpop.f32.mrb[12].mxu1 }
 0x418   :  { %v1358_v63 = vadd.f32 %v1310_v3, %v1079_v58  ;;  %v1312_v34 = vpop.f32.mrb[13].mxu0  ;;  %v1353_v45 = vpop.f32.mrb[13].mxu1  ;;  %v1081_v3 = vadd.f32 %v1077_v36, %v3485_v51 }
 0x419   :  { %v1359_v49 = vadd.f32 %v1312_v34, %v1080_v28  ;;  %v1314_v60 = vpop.f32.mrb[14].mxu0  ;;  %v1355_v39 = vpop.f32.mrb[14].mxu1  ;;  %v1361_v58 = vadd.f32 %v1353_v45, %v1082_v35 }
 0x41a   :  { %v2837_v41 = vmul.f32 -1.442695, %v1358_v63  ;;  %v1315_v38 = vpop.f32.mrb[15].mxu0  ;;  %v1356_v32 = vpop.f32.mrb[15].mxu1  ;;  %v1360_v34 = vadd.f32 %v1351_v59, %v1081_v3  ;;  %v1401_v3 = vmul.f32 %v3589_v4, %v3481_v0 }
 0x41b   :  { %v2838_v33 = vmul.f32 -1.442695, %v1359_v49  ;;  %v2839_v28 = vmul.f32 -1.442695, %v1361_v58  ;;  %v1399_v58 = vmul.f32 %v3589_v4, %v3461_v46 }
 0x41c   :  { %3139 = vpow2.f32 %v2837_v41 }
 0x41d   :  { %3141 = vpow2.f32 %v2838_v33 }
 0x41e   :  { %3143 = vpow2.f32 %v2839_v28  ;;  %v1400_v28 = vmul.f32 %v3589_v4, %v3466_v48 }
 0x41f   :  { %3145 = vtanh.f32 %v1360_v34  ;;  %v1402_v34 = vmul.f32 %v3589_v4, %v3474_v55 }
 0x426   :  { %v3140_v5 = vpop.eup %3139 }
 0x427   :  { %v3142_v54 = vpop.eup %3141  ;;  %v1365_v60 = vadd.f32 1.0, %v3140_v5 }
 0x428   :  { %v1371_v63 = vadd.f32 1.0, %v3142_v54  ;;  %v3144_v49 = vpop.eup %3143 }
 0x429   :  { %3147 = vrcp.f32 %v1365_v60  ;;  %v3146_v39 = vpop.eup %3145  ;;  %v1378_v32 = vadd.f32 1.0, %v3144_v49  ;;  %v1403_v60 = vadd.f32 %v1399_v58, %v3469_v52 }
 0x42a   :  { %3149 = vrcp.f32 %v1371_v63  ;;  %v1405_v63 = vadd.f32 %v1401_v3, %v3485_v51 }
 0x42b   :  { %3151 = vrcp.f32 %v1378_v32 }
 0x433   :  { %v3148_v41 = vpop.eup %3147 }
 0x434   :  { %v3150_v57 = vpop.eup %3149  ;;  %v1382_v38 = vmul.f32 %v3148_v41, %v3146_v39  ;;  %v3947_v41 = vld [vmem:[#allocation6_spill] sm:$0xff] }
 0x435   :  { %v1381_v50 = vmul.f32 %v3150_v57, %v3611_v37  ;;  %v3152_v59 = vpop.eup %3151  ;;  %v1404_v57 = vadd.f32 %v1400_v28, %v3947_v41 }
 0x437   :  { %v3733_v45 = vadd.f32 %v1382_v38, %v1381_v50  ;;  %v1406_v38 = vadd.f32 %v1402_v34, %v3479_v62 }
 0x439   :  { %3153 = vtanh.f32 %v3733_v45 }
 0x443   :  { %v3154_v5 = vpop.eup %3153 }
 0x444   :  { %v1385_v33 = vmul.f32 %v3154_v5, %v3152_v59 }
 0x446   :  { %v1407_v35 = vpack.c.bf16 %v1385_v33, %v1385_v33  ;;  %v1386_v54 = vmul.f32 %v3494_v40, %v1385_v33 }
 0x448   :  { %1633 = vmatmul.mubr.bf16.vlgmr.msra.gmra.mrb[16].mxu0 %v1407_v35  ;;  %1674 = vmatmul.mubr.bf16.vlgmr.msra.gmra.mrb[16].mxu1 %v1407_v35 }
 0x449   :  { %1387 = vadd.xlane.f32.xlu1 %v1386_v54  ;;  %1925 = vmatpush1.bf16.msra.mxu0 %v3621_v47 }
 0x44a   :  { %1966 = vmatpush1.bf16.msra.mxu1 %v3623_v1  ;;  %1926 = vmatprep.subr.bf16.mxu0 %v3629_v61 }
 0x44b   :  { %1967 = vmatprep.subr.bf16.mxu1 %v3631_v43  ;;  %1956 = vmatprep.mubr.bf16.mxu0 %v3945_v31 }
 0x44c   :  { %1997 = vmatprep.mubr.bf16.mxu1 %v3945_v31 }
 0x44d   :  { %1927 = vmatpush1.bf16.msra.mxu0 %v3633_v56 }
 0x44e   :  { %1968 = vmatpush1.bf16.msra.mxu1 %v3635_v44  ;;  %1928 = vmatprep.subr.bf16.mxu0 %v3641_v6 }
 0x44f   :  { %1969 = vmatprep.subr.bf16.mxu1 %v3643_v7 }
 0x451   :  { %1929 = vmatpush1.bf16.msra.mxu0 %v3645_v8 }
 0x452   :  { %1970 = vmatpush1.bf16.msra.mxu1 %v3647_v9  ;;  %1930 = vmatprep.subr.bf16.mxu0 %v3653_v10 }
 0x453   :  { %1971 = vmatprep.subr.bf16.mxu1 %v3655_v11 }
 0x455   :  { %1931 = vmatpush1.bf16.msra.mxu0 %v3657_v12 }
 0x456   :  { %1972 = vmatpush1.bf16.msra.mxu1 %v3659_v13  ;;  %1932 = vmatprep.subr.bf16.mxu0 %v3665_v14 }
 0x457   :  { %1973 = vmatprep.subr.bf16.mxu1 %v3667_v15 }
 0x459   :  { %1933 = vmatpush1.bf16.msra.mxu0 %v3669_v16 }
 0x45a   :  { %1974 = vmatpush1.bf16.msra.mxu1 %v3671_v17  ;;  %1934 = vmatprep.subr.bf16.mxu0 %v3675_v18 }
 0x45b   :  { %1975 = vmatprep.subr.bf16.mxu1 %v3683_v21 }
 0x45d   :  { %1935 = vmatpush1.bf16.msra.mxu0 %v3679_v19 }
 0x45e   :  { %1976 = vmatpush1.bf16.msra.mxu1 %v3681_v20  ;;  %1936 = vmatprep.subr.bf16.mxu0 %v3686_v22 }
 0x45f   :  { %1977 = vmatprep.subr.bf16.mxu1 %v3688_v23 }
 0x461   :  { %1937 = vmatpush1.bf16.msra.mxu0 %v3693_v24 }
 0x462   :  { %1978 = vmatpush1.bf16.msra.mxu1 %v3695_v25  ;;  %1938 = vmatprep.subr.bf16.mxu0 %v3699_v26 }
 0x463   :  { %1979 = vmatprep.subr.bf16.mxu1 %v3701_v27 }
 0x465   :  { %1939 = vmatpush1.bf16.msra.mxu0 %v3705_v29 }
 0x466   :  { %1980 = vmatpush1.bf16.msra.mxu1 %v3707_v30  ;;  %2248 = vmatprep.subr.bf16.mxu0 %v3617_v42 }
 0x467   :  { %2289 = vmatprep.subr.bf16.mxu1 %v3619_v2 }
 0x4d6   :  { %v1388_v37 = vpop.xlane.xlu1 %1387 }
 0x4d7   :  { %v1389_v36 = vadd.f32 %v3537_v53, %v1388_v37 }
 0x4d9   :  { %2840 = vst.msk [vmem:[%s3927_s6 + $0x6] sm:$0x3] %vm418_vm0, %v1389_v36 }
 0x51b   :  { %v1634_v49 = vpop.f32.mrb[16].mxu0  ;;  %v1675_v39 = vpop.f32.mrb[16].mxu1 }
 0x51c   :  { %v1682_v32 = vadd.f32 %v1634_v49, %v1403_v60  ;;  %v1684_v50 = vadd.f32 %v1675_v39, %v1405_v63  ;;  %v1636_v59 = vpop.f32.mrb[17].mxu0  ;;  %v1677_v5 = vpop.f32.mrb[17].mxu1 }
 0x51d   :  { %v1683_v33 = vadd.f32 %v1636_v59, %v1404_v57  ;;  %v1685_v35 = vadd.f32 %v1677_v5, %v1406_v38  ;;  %v1638_v54 = vpop.f32.mrb[18].mxu0  ;;  %v1679_v37 = vpop.f32.mrb[18].mxu1 }
 0x51e   :  { %v2874_v36 = vmul.f32 -1.442695, %v1682_v32  ;;  %v1639_v4 = vpop.f32.mrb[19].mxu0  ;;  %v1680_v0 = vpop.f32.mrb[19].mxu1 }
 0x51f   :  { %v2875_v58 = vmul.f32 -1.442695, %v1683_v33  ;;  %v2876_v3 = vmul.f32 -1.442695, %v1685_v35  ;;  %v3948_v35 = vld [vmem:[#allocation10_spill] sm:$0xff] }
 0x520   :  { %3155 = vpow2.f32 %v2874_v36  ;;  %v1723_v54 = vmul.f32 %v3948_v35, %v3461_v46  ;;  %v1724_v37 = vmul.f32 %v3948_v35, %v3466_v48 }
 0x521   :  { %3157 = vpow2.f32 %v2875_v58 }
 0x522   :  { %3159 = vpow2.f32 %v2876_v3  ;;  %v1727_v36 = vadd.f32 %v1723_v54, %v3469_v52 }
 0x523   :  { %3161 = vtanh.f32 %v1684_v50 }
 0x52a   :  { %v3156_v51 = vpop.eup %3155 }
 0x52b   :  { %v3158_v55 = vpop.eup %3157  ;;  %v1689_v28 = vadd.f32 1.0, %v3156_v51 }
 0x52c   :  { %v1695_v34 = vadd.f32 1.0, %v3158_v55  ;;  %v3160_v60 = vpop.eup %3159 }
 0x52d   :  { %3163 = vrcp.f32 %v1689_v28  ;;  %v3162_v63 = vpop.eup %3161  ;;  %v1702_v38 = vadd.f32 1.0, %v3160_v60  ;;  %v3949_v60 = vld [vmem:[#allocation7_spill] sm:$0xff] }
 0x52e   :  { %3165 = vrcp.f32 %v1695_v34 }
 0x52f   :  { %3167 = vrcp.f32 %v1702_v38 }
 0x537   :  { %v3164_v49 = vpop.eup %3163 }
 0x538   :  { %v3166_v39 = vpop.eup %3165  ;;  %v1706_v57 = vmul.f32 %v3164_v49, %v3162_v63  ;;  %v1726_v63 = vmul.f32 %v3948_v35, %v3949_v60 }
 0x539   :  { %v1705_v0 = vmul.f32 %v3166_v39, %v3733_v45  ;;  %v3168_v59 = vpop.eup %3167 }
 0x53b   :  { %v3789_v32 = vadd.f32 %v1706_v57, %v1705_v0 }
 0x53d   :  { %3169 = vtanh.f32 %v3789_v32 }
 0x547   :  { %v3170_v51 = vpop.eup %3169 }
 0x548   :  { %v1709_v5 = vmul.f32 %v3170_v51, %v3168_v59  ;;  %v1730_v51 = vadd.f32 %v1726_v63, %v3479_v62 }
 0x54a   :  { %v1731_v50 = vpack.c.bf16 %v1709_v5, %v1709_v5  ;;  %v1710_v55 = vmul.f32 %v3494_v40, %v1709_v5  ;;  %v3950_v5 = vld [vmem:[#allocation8_spill] sm:$0xff] }
 0x54c   :  { %1957 = vmatmul.mubr.bf16.vlgmr.msra.gmra.mrb[20].mxu0 %v1731_v50  ;;  %1998 = vmatmul.mubr.bf16.vlgmr.msra.gmra.mrb[20].mxu1 %v1731_v50  ;;  %v1725_v50 = vmul.f32 %v3948_v35, %v3950_v5 }
 0x54d   :  { %1711 = vadd.xlane.f32.xlu0 %v1710_v55  ;;  %2249 = vmatpush1.bf16.msra.mxu0 %v3621_v47 }
 0x54e   :  { %2290 = vmatpush1.bf16.msra.mxu1 %v3623_v1  ;;  %2250 = vmatprep.subr.bf16.mxu0 %v3629_v61 }
 0x54f   :  { %2291 = vmatprep.subr.bf16.mxu1 %v3631_v43  ;;  %2280 = vmatprep.mubr.bf16.mxu0 %v3945_v31 }
 0x550   :  { %2321 = vmatprep.mubr.bf16.mxu1 %v3945_v31 }
 0x551   :  { %2251 = vmatpush1.bf16.msra.mxu0 %v3633_v56 }
 0x552   :  { %2292 = vmatpush1.bf16.msra.mxu1 %v3635_v44  ;;  %2252 = vmatprep.subr.bf16.mxu0 %v3641_v6 }
 0x553   :  { %2293 = vmatprep.subr.bf16.mxu1 %v3643_v7 }
 0x555   :  { %2253 = vmatpush1.bf16.msra.mxu0 %v3645_v8 }
 0x556   :  { %2294 = vmatpush1.bf16.msra.mxu1 %v3647_v9  ;;  %2254 = vmatprep.subr.bf16.mxu0 %v3653_v10 }
 0x557   :  { %2295 = vmatprep.subr.bf16.mxu1 %v3655_v11 }
 0x559   :  { %2255 = vmatpush1.bf16.msra.mxu0 %v3657_v12 }
 0x55a   :  { %2296 = vmatpush1.bf16.msra.mxu1 %v3659_v13  ;;  %2256 = vmatprep.subr.bf16.mxu0 %v3665_v14 }
 0x55b   :  { %2297 = vmatprep.subr.bf16.mxu1 %v3667_v15 }
 0x55d   :  { %2257 = vmatpush1.bf16.msra.mxu0 %v3669_v16 }
 0x55e   :  { %2298 = vmatpush1.bf16.msra.mxu1 %v3671_v17  ;;  %2258 = vmatprep.subr.bf16.mxu0 %v3675_v18 }
 0x55f   :  { %2299 = vmatprep.subr.bf16.mxu1 %v3683_v21 }
 0x561   :  { %2259 = vmatpush1.bf16.msra.mxu0 %v3679_v19 }
 0x562   :  { %2300 = vmatpush1.bf16.msra.mxu1 %v3681_v20  ;;  %2260 = vmatprep.subr.bf16.mxu0 %v3686_v22 }
 0x563   :  { %2301 = vmatprep.subr.bf16.mxu1 %v3688_v23 }
 0x565   :  { %2261 = vmatpush1.bf16.msra.mxu0 %v3693_v24 }
 0x566   :  { %2302 = vmatpush1.bf16.msra.mxu1 %v3695_v25  ;;  %2262 = vmatprep.subr.bf16.mxu0 %v3699_v26 }
 0x567   :  { %2303 = vmatprep.subr.bf16.mxu1 %v3701_v27 }
 0x569   :  { %2263 = vmatpush1.bf16.msra.mxu0 %v3705_v29 }
 0x56a   :  { %2304 = vmatpush1.bf16.msra.mxu1 %v3707_v30  ;;  %2572 = vmatprep.subr.bf16.mxu0 %v3617_v42 }
 0x56b   :  { %2613 = vmatprep.subr.bf16.mxu1 %v3619_v2  ;;  %v1728_v2 = vadd.f32 %v1724_v37, %v3947_v41 }
 0x5da   :  { %v1712_v45 = vpop.xlane.xlu0 %1711 }
 0x5db   :  { %v1713_v33 = vadd.f32 %v3537_v53, %v1712_v45  ;;  %v3951_v45 = vld [vmem:[#allocation9_spill] sm:$0xff] }
 0x5dd   :  { %2877 = vst.msk [vmem:[%s3927_s6 + $0x8] sm:$0x3] %vm418_vm0, %v1713_v33  ;;  %v1729_v33 = vadd.f32 %v1725_v50, %v3951_v45 }
 0x61f   :  { %v1958_v4 = vpop.f32.mrb[20].mxu0  ;;  %v1999_v42 = vpop.f32.mrb[20].mxu1 }
 0x620   :  { %v2006_v58 = vadd.f32 %v1958_v4, %v1727_v36  ;;  %v1960_v3 = vpop.f32.mrb[21].mxu0  ;;  %v2001_v28 = vpop.f32.mrb[21].mxu1  ;;  %v2008_v37 = vadd.f32 %v1999_v42, %v1729_v33 }
 0x621   :  { %v2007_v34 = vadd.f32 %v1960_v3, %v1728_v2  ;;  %v1962_v49 = vpop.f32.mrb[22].mxu0  ;;  %v2003_v39 = vpop.f32.mrb[22].mxu1  ;;  %v2009_v55 = vadd.f32 %v2001_v28, %v1730_v51 }
 0x622   :  { %v2911_v57 = vmul.f32 -1.442695, %v2006_v58  ;;  %v1963_v38 = vpop.f32.mrb[23].mxu0  ;;  %v2004_v0 = vpop.f32.mrb[23].mxu1 }
 0x623   :  { %v2912_v59 = vmul.f32 -1.442695, %v2007_v34  ;;  %v2913_v54 = vmul.f32 -1.442695, %v2009_v55 }
 0x624   :  { %3171 = vpow2.f32 %v2911_v57 }
 0x625   :  { %3173 = vpow2.f32 %v2912_v59 }
 0x626   :  { %3175 = vpow2.f32 %v2913_v54 }
 0x627   :  { %3177 = vtanh.f32 %v2008_v37 }
 0x62e   :  { %v3172_v36 = vpop.eup %3171 }
 0x62f   :  { %v3174_v4 = vpop.eup %3173  ;;  %v2013_v2 = vadd.f32 1.0, %v3172_v36 }
 0x630   :  { %v2019_v58 = vadd.f32 1.0, %v3174_v4  ;;  %v3176_v3 = vpop.eup %3175 }
 0x631   :  { %3179 = vrcp.f32 %v2013_v2  ;;  %v3178_v34 = vpop.eup %3177  ;;  %v2026_v57 = vadd.f32 1.0, %v3176_v3  ;;  %v3219_v3 = vld [vmem:[%s3925_s4] ss:$0 sm:$0xff] }
 0x632   :  { %3181 = vrcp.f32 %v2019_v58 }
 0x633   :  { %3183 = vrcp.f32 %v2026_v57 }
 0x63b   :  { %v3180_v49 = vpop.eup %3179 }
 0x63c   :  { %v3182_v63 = vpop.eup %3181  ;;  %v2030_v39 = vmul.f32 %v3180_v49, %v3178_v34 }
 0x63d   :  { %v2029_v35 = vmul.f32 %v3182_v63, %v3789_v32  ;;  %v3184_v42 = vpop.eup %3183  ;;  %v3220_v63 = vld [vmem:[#allocation2] ss:$0 sm:$0xff] }
 0x63f   :  { %v3845_v28 = vadd.f32 %v2030_v39, %v2029_v35 }
 0x641   :  { %3185 = vtanh.f32 %v3845_v28 }
 0x64b   :  { %v3186_v38 = vpop.eup %3185 }
 0x64c   :  { %v2033_v0 = vmul.f32 %v3186_v38, %v3184_v42 }
 0x64e   :  { %v2055_v59 = vpack.c.bf16 %v2033_v0, %v2033_v0  ;;  %v2034_v51 = vmul.f32 %v3494_v40, %v2033_v0  ;;  %v2952_v40 = vld [vmem:[%s3921_s0 + $0x38] sm:$0xff] }
 0x650   :  { %2281 = vmatmul.mubr.bf16.vlgmr.msra.gmra.mrb[24].mxu0 %v2055_v59  ;;  %2322 = vmatmul.mubr.bf16.vlgmr.msra.gmra.mrb[24].mxu1 %v2055_v59 }
 0x651   :  { %2035 = vadd.xlane.f32.xlu1 %v2034_v51  ;;  %2573 = vmatpush1.bf16.msra.mxu0 %v3621_v47 }
 0x652   :  { %2614 = vmatpush1.bf16.msra.mxu1 %v3623_v1  ;;  %2574 = vmatprep.subr.bf16.mxu0 %v3629_v61  ;;  %v3952_v1 = vld [vmem:[#allocation11_spill] sm:$0xff] }
 0x653   :  { %2615 = vmatprep.subr.bf16.mxu1 %v3631_v43  ;;  %2604 = vmatprep.mubr.bf16.mxu0 %v3945_v31  ;;  %v2047_v61 = vmul.f32 %v3952_v1, %v3461_v46  ;;  %v2048_v43 = vmul.f32 %v3952_v1, %v3466_v48 }
 0x654   :  { %2645 = vmatprep.mubr.bf16.mxu1 %v3945_v31 }
 0x655   :  { %2575 = vmatpush1.bf16.msra.mxu0 %v3633_v56  ;;  %v2051_v56 = vadd.f32 %v2047_v61, %v3469_v52 }
 0x656   :  { %2616 = vmatpush1.bf16.msra.mxu1 %v3635_v44  ;;  %2576 = vmatprep.subr.bf16.mxu0 %v3641_v6 }
 0x657   :  { %2617 = vmatprep.subr.bf16.mxu1 %v3643_v7  ;;  %v2052_v7 = vadd.f32 %v2048_v43, %v3947_v41 }
 0x659   :  { %2577 = vmatpush1.bf16.msra.mxu0 %v3645_v8 }
 0x65a   :  { %2618 = vmatpush1.bf16.msra.mxu1 %v3647_v9  ;;  %2578 = vmatprep.subr.bf16.mxu0 %v3653_v10 }
 0x65b   :  { %2619 = vmatprep.subr.bf16.mxu1 %v3655_v11  ;;  %v2050_v11 = vmul.f32 %v3952_v1, %v3949_v60 }
 0x65d   :  { %2579 = vmatpush1.bf16.msra.mxu0 %v3657_v12 }
 0x65e   :  { %2620 = vmatpush1.bf16.msra.mxu1 %v3659_v13  ;;  %2580 = vmatprep.subr.bf16.mxu0 %v3665_v14 }
 0x65f   :  { %2621 = vmatprep.subr.bf16.mxu1 %v3667_v15 }
 0x661   :  { %2581 = vmatpush1.bf16.msra.mxu0 %v3669_v16 }
 0x662   :  { %2368 = vperm.xlu1 %2994, %v2952_v40   ;;  %2622 = vmatpush1.bf16.msra.mxu1 %v3671_v17 }
 0x663   :  { %2582 = vmatprep.subr.bf16.mxu0 %v3675_v18  ;;  %2623 = vmatprep.subr.bf16.mxu1 %v3683_v21  ;;  %v2054_v18 = vadd.f32 %v2050_v11, %v3479_v62 }
 0x665   :  { %2583 = vmatpush1.bf16.msra.mxu0 %v3679_v19  ;;  %v2049_v19 = vmul.f32 %v3952_v1, %v3950_v5 }
 0x666   :  { %2624 = vmatpush1.bf16.msra.mxu1 %v3681_v20  ;;  %2584 = vmatprep.subr.bf16.mxu0 %v3686_v22 }
 0x667   :  { %2625 = vmatprep.subr.bf16.mxu1 %v3688_v23  ;;  %v2053_v21 = vadd.f32 %v2049_v19, %v3951_v45 }
 0x669   :  { %2585 = vmatpush1.bf16.msra.mxu0 %v3693_v24 }
 0x66a   :  { %2626 = vmatpush1.bf16.msra.mxu1 %v3695_v25  ;;  %2586 = vmatprep.subr.bf16.mxu0 %v3699_v26 }
 0x66b   :  { %2627 = vmatprep.subr.bf16.mxu1 %v3701_v27 }
 0x66d   :  { %2587 = vmatpush1.bf16.msra.mxu0 %v3705_v29 }
 0x66e   :  { %2628 = vmatpush1.bf16.msra.mxu1 %v3707_v30 }
 0x6de   :  { %v2036_v31 = vpop.xlane.xlu1 %2035 }
 0x6df   :  { %v2037_v47 = vadd.f32 %v3537_v53, %v2036_v31 }
 0x6e1   :  { %2914 = vst.msk [vmem:[%s3927_s6 + $0xa] sm:$0x3] %vm418_vm0, %v2037_v47 }
 0x6e2   :  { %v2369_v57 = vpop.permute.xlu1 %2368 }
 0x6e3   :  { %v2371_v35 = vmul.f32 %v2369_v57, %v3461_v46  ;;  %v2374_v47 = vmul.f32 %v2369_v57, %v3949_v60 }
 0x6e5   :  { %v2375_v42 = vadd.f32 %v2371_v35, %v3469_v52  ;;  %v2373_v52 = vmul.f32 %v2369_v57, %v3950_v5 }
 0x723   :  { %v2282_v44 = vpop.f32.mrb[24].mxu0  ;;  %v2323_v6 = vpop.f32.mrb[24].mxu1 }
 0x724   :  { %v2330_v8 = vadd.f32 %v2282_v44, %v2051_v56  ;;  %v2284_v9 = vpop.f32.mrb[25].mxu0  ;;  %v2325_v53 = vpop.f32.mrb[25].mxu1  ;;  %v2332_v23 = vadd.f32 %v2323_v6, %v2053_v21 }
 0x725   :  { %v2331_v10 = vadd.f32 %v2284_v9, %v2052_v7  ;;  %v2286_v12 = vpop.f32.mrb[26].mxu0  ;;  %v2327_v13 = vpop.f32.mrb[26].mxu1  ;;  %v2333_v20 = vadd.f32 %v2325_v53, %v2054_v18 }
 0x726   :  { %v2948_v14 = vmul.f32 -1.442695, %v2330_v8  ;;  %v2287_v15 = vpop.f32.mrb[27].mxu0  ;;  %v2328_v16 = vpop.f32.mrb[27].mxu1 }
 0x727   :  { %v2949_v17 = vmul.f32 -1.442695, %v2331_v10  ;;  %v2950_v22 = vmul.f32 -1.442695, %v2333_v20 }
 0x728   :  { %3187 = vpow2.f32 %v2948_v14 }
 0x729   :  { %3189 = vpow2.f32 %v2949_v17 }
 0x72a   :  { %3191 = vpow2.f32 %v2950_v22 }
 0x72b   :  { %3193 = vtanh.f32 %v2332_v23 }
 0x732   :  { %v3188_v24 = vpop.eup %3187 }
 0x733   :  { %v3190_v25 = vpop.eup %3189  ;;  %v2337_v26 = vadd.f32 1.0, %v3188_v24 }
 0x734   :  { %v2343_v27 = vadd.f32 1.0, %v3190_v25  ;;  %v3192_v29 = vpop.eup %3191 }
 0x735   :  { %3195 = vrcp.f32 %v2337_v26  ;;  %v3194_v30 = vpop.eup %3193  ;;  %v2350_v33 = vadd.f32 1.0, %v3192_v29 }
 0x736   :  { %3197 = vrcp.f32 %v2343_v27 }
 0x737   :  { %3199 = vrcp.f32 %v2350_v33 }
 0x73f   :  { %v3196_v32 = vpop.eup %3195 }
 0x740   :  { %v3198_v50 = vpop.eup %3197  ;;  %v2354_v55 = vmul.f32 %v3196_v32, %v3194_v30 }
 0x741   :  { %v2353_v54 = vmul.f32 %v3198_v50, %v3845_v28  ;;  %v3200_v36 = vpop.eup %3199  ;;  %v2372_v28 = vmul.f32 %v2369_v57, %v3466_v48  ;;  %v2378_v48 = vadd.f32 %v2374_v47, %v3479_v62 }
 0x743   :  { %v2355_v37 = vadd.f32 %v2354_v55, %v2353_v54  ;;  %v2376_v59 = vadd.f32 %v2372_v28, %v3947_v41  ;;  %v2377_v41 = vadd.f32 %v2373_v52, %v3951_v45 }
 0x745   :  { %3201 = vtanh.f32 %v2355_v37 }
 0x74f   :  { %v3202_v4 = vpop.eup %3201 }
 0x750   :  { %v2357_v2 = vmul.f32 %v3202_v4, %v3200_v36 }
 0x752   :  { %v2379_v58 = vpack.c.bf16 %v2357_v2, %v2357_v2  ;;  %v2358_v34 = vmul.f32 %v3219_v3, %v2357_v2 }
 0x754   :  { %2605 = vmatmul.mubr.bf16.vlgmr.msra.gmra.mrb[28].mxu0 %v2379_v58  ;;  %2646 = vmatmul.mubr.bf16.vlgmr.msra.gmra.mrb[28].mxu1 %v2379_v58 }
 0x755   :  { %2359 = vadd.xlane.f32.xlu0 %v2358_v34 }
 0x7e2   :  { %v2360_v49 = vpop.xlane.xlu0 %2359 }
 0x7e3   :  { %v2361_v39 = vadd.f32 %v3220_v63, %v2360_v49 }
 0x7e5   :  { %2951 = vst.msk [vmem:[%s3927_s6 + $0xc] sm:$0x3] %vm418_vm0, %v2361_v39 }
 0x827   :  { %v2606_v38 = vpop.f32.mrb[28].mxu0  ;;  %v2647_v0 = vpop.f32.mrb[28].mxu1 }
 0x828   :  { %v2654_v51 = vadd.f32 %v2606_v38, %v2375_v42  ;;  %v2608_v40 = vpop.f32.mrb[29].mxu0  ;;  %v2649_v31 = vpop.f32.mrb[29].mxu1  ;;  %v2656_v9 = vadd.f32 %v2647_v0, %v2377_v41 }
 0x829   :  { %v2655_v1 = vadd.f32 %v2608_v40, %v2376_v59  ;;  %v2610_v61 = vpop.f32.mrb[30].mxu0  ;;  %v2651_v43 = vpop.f32.mrb[30].mxu1  ;;  %v2657_v7 = vadd.f32 %v2649_v31, %v2378_v48 }
 0x82a   :  { %v2985_v56 = vmul.f32 -1.442695, %v2654_v51  ;;  %v2611_v44 = vpop.f32.mrb[31].mxu0  ;;  %v2652_v6 = vpop.f32.mrb[31].mxu1 }
 0x82b   :  { %v2986_v46 = vmul.f32 -1.442695, %v2655_v1  ;;  %v2987_v8 = vmul.f32 -1.442695, %v2657_v7 }
 0x82c   :  { %3203 = vpow2.f32 %v2985_v56 }
 0x82d   :  { %3205 = vpow2.f32 %v2986_v46 }
 0x82e   :  { %3207 = vpow2.f32 %v2987_v8 }
 0x82f   :  { %3209 = vtanh.f32 %v2656_v9 }
 0x836   :  { %v3204_v53 = vpop.eup %3203 }
 0x837   :  { %v3206_v60 = vpop.eup %3205  ;;  %v2661_v10 = vadd.f32 1.0, %v3204_v53 }
 0x838   :  { %v2667_v11 = vadd.f32 1.0, %v3206_v60  ;;  %v3208_v12 = vpop.eup %3207 }
 0x839   :  { %3211 = vrcp.f32 %v2661_v10  ;;  %v3210_v13 = vpop.eup %3209  ;;  %v2674_v16 = vadd.f32 1.0, %v3208_v12 }
 0x83a   :  { %3213 = vrcp.f32 %v2667_v11 }
 0x83b   :  { %3215 = vrcp.f32 %v2674_v16 }
 0x843   :  { %v3212_v14 = vpop.eup %3211 }
 0x844   :  { %v3214_v15 = vpop.eup %3213  ;;  %v2678_v62 = vmul.f32 %v3212_v14, %v3210_v13 }
 0x845   :  { %v2677_v5 = vmul.f32 %v3214_v15, %v2355_v37  ;;  %v3216_v45 = vpop.eup %3215 }
 0x847   :  { %v2679_v17 = vadd.f32 %v2678_v62, %v2677_v5 }
 0x849   :  { %3217 = vtanh.f32 %v2679_v17 }
 0x853   :  { %v3218_v18 = vpop.eup %3217 }
 0x854   :  { %v2681_v19 = vmul.f32 %v3218_v18, %v3216_v45 }
 0x856   :  { %v2682_v20 = vmul.f32 %v3219_v3, %v2681_v19 }
 0x858   :  { %2683 = vadd.xlane.f32.xlu0 %v2682_v20 }
 0x8e5   :  { %v2684_v21 = vpop.xlane.xlu0 %2683 }
 0x8e6   :  { %v2685_v22 = vadd.f32 %v3220_v63, %v2684_v21 }
 0x8e8   :  { %2988 = vst.msk [vmem:[%s3927_s6 + $0xe] sm:$0x3] %vm418_vm0, %v2685_v22 }
 0x8e9   :  { %2692 = vsyncpa [#allocation4], 1 }

</bundles_post_ra>
